<compile_context>
chip_gen: v6e
topology: v6e:2x2x1
jax: 0.10.0
libtpu: 0.0.40
codegen_flags: <defaults>
</compile_context>

<pallas_src>
import functools

import jax
import jax.numpy as jnp
from jax import lax
from jax.experimental import pallas as pl
from jax.experimental.pallas import tpu as pltpu

# ---------------- hyper-parameters (module defaults) ----------------
NUM_FEATURES = 64      # C
NUM_CHANNELS = 32      # d  (channels per whitening group)
NUM_CLASSES = 2        # number of domains
T_ITERS = 5
EPS = 1e-5
MOMENTUM = 0.1

HIGH = lax.Precision.HIGHEST


# ---------------- generation-aware budgets ----------------
@functools.lru_cache(maxsize=None)
def _tpu_budgets():
    """(vmem_limit_bytes, max_tile_bytes, fused_group_block_budget) for the local TPU."""
    try:
        cap = int(getattr(pltpu.get_tpu_info(), "vmem_capacity_bytes", 0)) or 64 * 2**20
    except Exception:
        cap = 64 * 2**20
    if cap >= 100 * 2**20:                      # v5e / v6e: 128 MiB VMEM
        return 96 * 2**20, 8 * 2**20, 20 * 2**20
    # v7x (64 MiB per TensorCore) or unknown: conservative budgets
    return 36 * 2**20, 2 * 2**20, 7 * 2**20


def _loop(n, body):
    """Static unroll for short trip counts, scf.for otherwise (keeps code size bounded)."""
    if n <= 8:
        for i in range(n):
            body(i)
    else:
        pl.loop(0, n)(body)


def _plan_two_pass(n, d, hw, max_tile_bytes):
    """Pick (hw_pad, hw_tile, nb) for the streaming two-pass path (bf16 input stream)."""
    bytes_per_col = d * 2
    if hw * bytes_per_col <= max_tile_bytes:
        hw_pad, hw_tile = hw, hw                           # full extent: always layout-legal
    else:
        max_cols = max(128, max_tile_bytes // bytes_per_col)
        cand = (max_cols // 128) * 128
        hw_tile = 0
        while cand >= 128:
            if hw % cand == 0:
                hw_pad, hw_tile = hw, cand
                break
            cand -= 128
        if hw_tile == 0:
            # no 128-multiple divisor fits: zero-pad HW up to a multiple of 128 (zeros are
            # harmless for the stats; the extra apply columns are sliced off by the wrapper).
            hw_pad = ((hw + 127) // 128) * 128
            cand = (max_cols // 128) * 128
            hw_tile = 128
            while cand >= 128:
                if hw_pad % cand == 0:
                    hw_tile = cand
                    break
                cand -= 128
    # block the batch axis so each streamed block is reasonably large (cap the in-kernel unroll)
    nb = 1
    for cand in range(min(n, 8), 0, -1):
        if n % cand == 0 and cand * d * hw_tile * 2 <= max(max_tile_bytes, d * hw_tile * 2):
            nb = cand
            break
    return hw_pad, hw_tile, nb


# ---------------- fused single-pass kernel (x resident in VMEM per group) ----------------
def _fused_kernel(x_ref, w_ref, b_ref, y_ref, mean_ref, wm_ref, acc_sc, s_sc, *, m, T, eps):
    n_blk, d, _ = x_ref.shape

    # --- stats: sum(x) and x@x^T (bf16 operands, f32 accumulation) ---
    acc_sc[...] = jnp.zeros((d, d), jnp.float32)
    s_sc[...] = jnp.zeros((d, 1), jnp.float32)

    def stats_step(i):
        xi = x_ref[i]                                            # (d, HW) bf16
        acc_sc[...] += jnp.dot(xi, xi.T, preferred_element_type=jnp.float32)
        s_sc[...] += jnp.sum(xi.astype(jnp.float32), axis=1, keepdims=True)

    _loop(n_blk, stats_step)

    # --- whitening solve (f32, all 32x32) ---
    mean = s_sc[...] * (1.0 / m)                                 # (d, 1)
    eye = (lax.broadcasted_iota(jnp.int32, (d, d), 0)
           == lax.broadcasted_iota(jnp.int32, (d, d), 1)).astype(jnp.float32)
    mean_row = jnp.sum(eye * mean, axis=0, keepdims=True)        # (1, d) without a transpose
    sigma = acc_sc[...] * (1.0 / m) - mean * mean_row + eps * eye
    tr = jnp.sum(jnp.sum(sigma * eye, axis=1, keepdims=True), axis=0, keepdims=True)
    r_tr = 1.0 / jnp.maximum(tr, eps)                            # cancellation / PSD guard
    sigma_n = sigma * r_tr
    p = eye
    for _ in range(T):                                           # Newton-Schulz, static unroll
        p2 = jnp.dot(p, p, preferred_element_type=jnp.float32)
        p3 = jnp.dot(p2, p, preferred_element_type=jnp.float32)
        p = 1.5 * p - 0.5 * jnp.dot(p3, sigma_n, preferred_element_type=jnp.float32)
    wm = p * jnp.sqrt(r_tr)                                      # Sigma^{-1/2}
    wp = w_ref[...] * wm                                         # diag(weight) @ wm (row scaling)
    bp = b_ref[...] - jnp.sum(wp * mean_row, axis=1, keepdims=True)   # bias - wp @ mean
    wpb = wp.astype(jnp.bfloat16)

    # --- apply: out = W' @ x + b'  from the resident copy ---
    def apply_step(i):
        y = jnp.dot(wpb, x_ref[i], preferred_element_type=jnp.float32) + bp
        y_ref[i] = y.astype(y_ref.dtype)

    _loop(n_blk, apply_step)

    mean_ref[...] = mean
    wm_ref[...] = wm


def dsbw_fused_pallas(x_flat_bf16, weight_gd1, bias_gd1, *, groups, d, T, eps,
                      out_dtype, vmem_limit):
    n, c, hw = x_flat_bf16.shape
    m = n * hw
    kernel = functools.partial(_fused_kernel, m=m, T=T, eps=eps)
    return pl.pallas_call(
        kernel,
        out_shape=(jax.ShapeDtypeStruct((n, c, hw), out_dtype),
                   jax.ShapeDtypeStruct((groups, d, 1), jnp.float32),
                   jax.ShapeDtypeStruct((groups, d, d), jnp.float32)),
        grid_spec=pltpu.PrefetchScalarGridSpec(
            num_scalar_prefetch=0,
            grid=(groups,),
            in_specs=[pl.BlockSpec((n, d, hw), lambda gi: (0, gi, 0)),
                      pl.BlockSpec((None, d, 1), lambda gi: (gi, 0, 0)),
                      pl.BlockSpec((None, d, 1), lambda gi: (gi, 0, 0))],
            out_specs=[pl.BlockSpec((n, d, hw), lambda gi: (0, gi, 0)),
                       pl.BlockSpec((None, d, 1), lambda gi: (gi, 0, 0)),
                       pl.BlockSpec((None, d, d), lambda gi: (gi, 0, 0))],
            scratch_shapes=[pltpu.VMEM((d, d), jnp.float32),
                            pltpu.VMEM((d, 1), jnp.float32)]),
        compiler_params=pltpu.CompilerParams(
            dimension_semantics=("parallel",),
            vmem_limit_bytes=vmem_limit),
    )(x_flat_bf16, weight_gd1, bias_gd1)


# ---------------- two-pass fallback: pass 1 (streaming stats) ----------------
def _stats_kernel(x_ref, xxt_ref, xsum_ref):
    @pl.when((pl.program_id(2) == 0) & (pl.program_id(3) == 0))
    def _init():
        xxt_ref[...] = jnp.zeros_like(xxt_ref)
        xsum_ref[...] = jnp.zeros_like(xsum_ref)

    def step(i):
        xi = x_ref[i]                                            # (d, hw_tile) bf16
        xxt_ref[...] += jnp.dot(xi, xi.T, preferred_element_type=jnp.float32)
        xsum_ref[...] += jnp.sum(xi.astype(jnp.float32), axis=1, keepdims=True)

    _loop(x_ref.shape[0], step)


def dsbw_stats_pallas(x_flat, *, groups, d, hw_tile, nb, vmem_limit):
    n, c, hw = x_flat.shape
    n_hw = hw // hw_tile
    n_blocks = n // nb
    # keep both v7x TensorCores busy even when groups == 1: split the batch-block reduction
    # into 2 parallel partial accumulations (summed afterwards in _solve_whitening).
    n_split = 2 if (groups == 1 and n_blocks % 2 == 0 and n_blocks >= 2) else 1
    nbs = n_blocks // n_split
    return pl.pallas_call(
        _stats_kernel,
        out_shape=(jax.ShapeDtypeStruct((groups, n_split, d, d), jnp.float32),
                   jax.ShapeDtypeStruct((groups, n_split, d, 1), jnp.float32)),
        grid_spec=pltpu.PrefetchScalarGridSpec(
            num_scalar_prefetch=0,
            grid=(groups, n_split, nbs, n_hw),
            in_specs=[pl.BlockSpec((nb, d, hw_tile),
                                   lambda gi, si, ni, hi: (si * nbs + ni, gi, hi))],
            out_specs=[pl.BlockSpec((None, None, d, d), lambda gi, si, ni, hi: (gi, si, 0, 0)),
                       pl.BlockSpec((None, None, d, 1), lambda gi, si, ni, hi: (gi, si, 0, 0))],
        ),
        compiler_params=pltpu.CompilerParams(
            dimension_semantics=("parallel", "parallel", "arbitrary", "arbitrary"),
            vmem_limit_bytes=vmem_limit),
    )(x_flat)


# ---------------- tiny per-group solve (plain JAX, off the streaming path) ----------------
def _solve_whitening(xxt_sum, x_sum, weight_gd, bias_gd, *, m, T, eps):
    g, d, _ = xxt_sum.shape
    mean = x_sum / m                                               # (g, d, 1)
    eye = jnp.eye(d, dtype=jnp.float32)
    sigma = xxt_sum / m - mean * jnp.swapaxes(mean, 1, 2) + eps * eye
    tr = jnp.maximum(jnp.trace(sigma, axis1=1, axis2=2), eps)[:, None, None]
    r_tr = 1.0 / tr
    sigma_n = sigma * r_tr
    p = jnp.broadcast_to(eye, (g, d, d))
    for _ in range(T):                                             # static unroll, 32x32 matmuls
        p3 = jnp.einsum('gij,gjk,gkl->gil', p, p, p, precision=HIGH)
        p = 1.5 * p - 0.5 * jnp.einsum('gij,gjk->gik', p3, sigma_n, precision=HIGH)
    wm = p * jnp.sqrt(r_tr)                                        # Sigma^{-1/2}
    wp = weight_gd[:, :, None] * wm                                # diag(weight) @ wm
    bp = bias_gd[:, :, None] - jnp.einsum('gij,gjk->gik', wp, mean, precision=HIGH)
    return mean, wm, wp, bp


# ---------------- two-pass fallback: pass 2 (streaming apply  out = W' @ x + b') ----------------
def _apply_kernel(x_ref, wp_ref, bp_ref, o_ref):
    wpb = wp_ref[...]                                    # (d, d) bf16, pre-cast in the wrapper
    bp = bp_ref[...]                                     # (d, 1) f32

    def step(i):
        y = jnp.dot(wpb, x_ref[i], preferred_element_type=jnp.float32) + bp
        o_ref[i] = y.astype(o_ref.dtype)

    _loop(x_ref.shape[0], step)


def dsbw_apply_pallas(x_flat, wp_bf16, bp, *, hw_tile, nb, out_dtype, vmem_limit):
    n, c, hw = x_flat.shape
    groups, d, _ = wp_bf16.shape
    n_hw = hw // hw_tile
    n_blocks = n // nb
    return pl.pallas_call(
        _apply_kernel,
        out_shape=jax.ShapeDtypeStruct((n, c, hw), out_dtype),
        grid_spec=pltpu.PrefetchScalarGridSpec(
            num_scalar_prefetch=0,
            grid=(groups, n_blocks, n_hw),
            in_specs=[pl.BlockSpec((nb, d, hw_tile), lambda gi, ni, hi: (ni, gi, hi)),
                      pl.BlockSpec((None, d, d), lambda gi, ni, hi: (gi, 0, 0)),
                      pl.BlockSpec((None, d, 1), lambda gi, ni, hi: (gi, 0, 0))],
            out_specs=pl.BlockSpec((nb, d, hw_tile), lambda gi, ni, hi: (ni, gi, hi)),
        ),
        compiler_params=pltpu.CompilerParams(
            dimension_semantics=("parallel", "parallel", "parallel"),
            vmem_limit_bytes=vmem_limit),
    )(x_flat, wp_bf16, bp)


# ---------------- functional forward (domain dispatch + running buffers) ----------------
def dsbw_forward(params, x_nchw, domain_label, *, num_channels=NUM_CHANNELS,
                 T=T_ITERS, eps=EPS, momentum=MOMENTUM, out_dtype=None,
                 force_two_pass=False):
    n, c, h, w = x_nchw.shape
    d = num_channels
    assert c % d == 0 and d % 8 == 0
    g = c // d
    hw = h * w
    m = n * hw
    if out_dtype is None:
        # bf16 output halves the write stream of this memory-bound op; keep 16-bit inputs as-is.
        out_dtype = x_nchw.dtype if jnp.dtype(x_nchw.dtype).itemsize <= 2 else jnp.bfloat16

    vmem_limit, max_tile_bytes, fused_budget = _tpu_budgets()

    dom = domain_label[0]
    weight_gd = params['weight'][dom].reshape(g, d)
    bias_gd = params['bias'][dom].reshape(g, d)

    # single bf16 HBM copy of x: halves every streaming read (stats + apply)
    # TODO(synk): offer an f32-Gram stats option for wide-dynamic-range inputs (cancellation in
    #             E[xx^T] - mu mu^T); the trace clamp below only guards the degenerate case.
    x_flat = x_nchw.reshape(n, c, hw).astype(jnp.bfloat16)

    group_block_bytes = n * d * hw * 2
    if (not force_two_pass) and group_block_bytes <= fused_budget:
        # fused path: x is read from HBM exactly once
        y_flat, mean, wm = dsbw_fused_pallas(
            x_flat, weight_gd[:, :, None], bias_gd[:, :, None],
            groups=g, d=d, T=T, eps=eps, out_dtype=out_dtype, vmem_limit=vmem_limit)
    else:
        hw_pad, hw_tile, nb = _plan_two_pass(n, d, hw, max_tile_bytes)
        xp = x_flat if hw_pad == hw else jnp.pad(x_flat, ((0, 0), (0, 0), (0, hw_pad - hw)))
        xxt_sum, x_sum = dsbw_stats_pallas(xp, groups=g, d=d, hw_tile=hw_tile, nb=nb,
                                           vmem_limit=vmem_limit)
        mean, wm, wp, bp = _solve_whitening(xxt_sum.sum(axis=1), x_sum.sum(axis=1),
                                            weight_gd, bias_gd, m=m, T=T, eps=eps)
        y_pad = dsbw_apply_pallas(xp, wp.astype(jnp.bfloat16), bp, hw_tile=hw_tile, nb=nb,
                                  out_dtype=out_dtype, vmem_limit=vmem_limit)
        y_flat = y_pad if hw_pad == hw else y_pad[:, :, :hw]

    x_hat = y_flat.reshape(n, c, h, w)

    # running-buffer momentum update for the selected domain (functional mirror of .copy_)
    new_rm = params['running_mean'].at[dom].set(
        momentum * mean + (1.0 - momentum) * params['running_mean'][dom])
    new_rwm = params['running_wm'].at[dom].set(
        momentum * wm + (1.0 - momentum) * params['running_wm'][dom])
    new_buffers = {'running_mean': new_rm, 'running_wm': new_rwm}

    return (x_hat, domain_label), new_buffers


# ---------------- pure-JAX references for correctness checking ----------------
def _ref_full(x_gdm, weight_gd, bias_gd, *, T=T_ITERS, eps=EPS):
    """Faithful f32/HIGHEST IterNorm math (mirrors PyTorch)."""
    g, d, m = x_gdm.shape
    mean = x_gdm.mean(-1, keepdims=True)
    xc = x_gdm - mean
    eye = jnp.eye(d, dtype=jnp.float32)
    sigma = eps * eye + (1.0 / m) * jnp.einsum('gdm,gem->gde', xc, xc, precision=HIGH)
    r_tr = 1.0 / jnp.trace(sigma, axis1=1, axis2=2)[:, None, None]
    sigma_n = sigma * r_tr
    p = jnp.broadcast_to(eye, (g, d, d))
    for _ in range(T):
        p3 = jnp.einsum('gij,gjk,gkl->gil', p, p, p, precision=HIGH)
        p = 1.5 * p - 0.5 * jnp.einsum('gij,gjk->gik', p3, sigma_n, precision=HIGH)
    wm = p * jnp.sqrt(r_tr)
    xn = jnp.einsum('gij,gjm->gim', wm, xc, precision=HIGH)
    return xn * weight_gd[:, :, None] + bias_gd[:, :, None]


def _ref_matched(x_gdm, weight_gd, bias_gd, *, T=T_ITERS, eps=EPS):
    """Same math pipeline as the Pallas two-pass path (bf16 streams, f32 solve, folded affine)."""
    g, d, m = x_gdm.shape
    xb = x_gdm.astype(jnp.bfloat16)
    xxt = lax.dot_general(xb, xb, (((2,), (2,)), ((0,), (0,))),
                          preferred_element_type=jnp.float32)
    x_sum = jnp.sum(xb.astype(jnp.float32), axis=2, keepdims=True)
    _, _, wp, bp = _solve_whitening(xxt, x_sum, weight_gd, bias_gd, m=m, T=T, eps=eps)
    y = lax.dot_general(wp.astype(jnp.bfloat16), xb, (((2,), (1,)), ((0,), (0,))),
                        preferred_element_type=jnp.float32) + bp
    return y


if __name__ == "__main__":
    key = jax.random.PRNGKey(0)
    k_x, k_w, k_b = jax.random.split(key, 3)

    # small, module-consistent shapes: N=2, C=64, H=W=8 -> g=2, d=32, m=128
    N, C, H, W = 2, NUM_FEATURES, 8, 8
    d = NUM_CHANNELS
    g = C // d

    x = jax.random.normal(k_x, (N, C, H, W), dtype=jnp.float32) * 2.0 + 0.5
    domain_label = jnp.array([1, 1], dtype=jnp.int32)

    params = {
        'weight': 1.0 + 0.1 * jax.random.normal(k_w, (NUM_CLASSES, C), dtype=jnp.float32),
        'bias': 0.1 * jax.random.normal(k_b, (NUM_CLASSES, C), dtype=jnp.float32),
        'running_mean': jnp.zeros((NUM_CLASSES, g, d, 1), dtype=jnp.float32),
        'running_wm': jnp.broadcast_to(jnp.eye(d, dtype=jnp.float32),
                                       (NUM_CLASSES, g, d, d)).copy(),
    }

    fwd_fused = jax.jit(dsbw_forward)
    fwd_two = jax.jit(functools.partial(dsbw_forward, force_two_pass=True))

    (y_fused, dom_out), buf_fused = fwd_fused(params, x, domain_label)
    (y_two, _), buf_two = fwd_two(params, x, domain_label)
    jax.block_until_ready(y_fused)
    jax.block_until_ready(y_two)
    jax.block_until_ready(buf_fused['running_wm'])

    # ---- correctness checks ----
    dom = int(domain_label[0])
    w_gd = params['weight'][dom].reshape(g, d)
    b_gd = params['bias'][dom].reshape(g, d)
    x_gdm = jnp.transpose(x, (1, 0, 2, 3)).reshape(g, d, N * H * W)

    def to_gdm(y):
        return jnp.transpose(y.astype(jnp.float32), (1, 0, 2, 3)).reshape(g, d, N * H * W)

    yf, yt = to_gdm(y_fused), to_gdm(y_two)

    assert y_fused.shape == x.shape and y_two.shape == x.shape
    assert dom_out.shape == domain_label.shape
    assert y_fused.dtype == jnp.bfloat16 and y_two.dtype == jnp.bfloat16
    assert buf_fused['running_mean'].shape == params['running_mean'].shape
    assert buf_fused['running_wm'].shape == params['running_wm'].shape

    # (1) two-pass path vs a precision-matched pure-JAX pipeline (output quantized to bf16 too)
    ref_m = _ref_matched(x_gdm, w_gd, b_gd).astype(jnp.bfloat16).astype(jnp.float32)
    assert jnp.allclose(yt, ref_m, rtol=1e-2, atol=1e-2), "two-pass mismatch vs matched reference"

    # (2) both paths vs the full-f32 PyTorch-equivalent math (norm-relative)
    ref_f = _ref_full(x_gdm, w_gd, b_gd)
    for name, yk in (("fused", yf), ("two-pass", yt)):
        rel = float(jnp.linalg.norm(yk - ref_f) / jnp.linalg.norm(ref_f))
        assert rel < 3e-2, f"{name}: relative error vs f32 reference too large: {rel}"

    # (3) fused and two-pass paths must agree (solve location/precision is the only difference)
    relx = float(jnp.linalg.norm(yf - yt) / jnp.linalg.norm(yt))
    assert relx < 2e-2, f"fused vs two-pass mismatch: {relx}"

    # TODO(synk): GroupItN ('GW' whitening) branch not implemented; only the default IterNorm path.
    print("KERNEL_OK")
</pallas_src>

<mosaic_0001>
module attributes {stable_mosaic.version = 11 : i64} {
  func.func @_fused_kernel(%arg0: i32, %arg1: memref<2x32x64xbf16, #tpu.memory_space<vmem>>, %arg2: memref<1x32x1xf32, #tpu.memory_space<vmem>>, %arg3: memref<1x32x1xf32, #tpu.memory_space<vmem>>, %arg4: memref<2x32x64xbf16, #tpu.memory_space<vmem>>, %arg5: memref<1x32x1xf32, #tpu.memory_space<vmem>>, %arg6: memref<1x32x32xf32, #tpu.memory_space<vmem>>, %arg7: memref<32x32xf32, #tpu.memory_space<vmem>>, %arg8: memref<32x1xf32, #tpu.memory_space<vmem>>) attributes {dimension_semantics = [#tpu.dimension_semantics<parallel>], iteration_bounds = array<i64: 2>, scalar_prefetch = 0 : i64, scratch_operands = 2 : i64, tpu.core_type = #tpu.core_type<tc>, window_params = [{transform_indices = @transform_0, window_bounds = array<i64: 2, 32, 64>}, {transform_indices = @transform_1, window_bounds = array<i64: 1, 32, 1>}, {transform_indices = @transform_2, window_bounds = array<i64: 1, 32, 1>}, {transform_indices = @transform_3, window_bounds = array<i64: 2, 32, 64>}, {transform_indices = @transform_4, window_bounds = array<i64: 1, 32, 1>}, {transform_indices = @transform_5, window_bounds = array<i64: 1, 32, 32>}]} {
    %cst = arith.constant 0.000000e+00 : f32
    %0 = vector.broadcast %cst : f32 to vector<32x32xf32>
    %c0 = arith.constant 0 : index
    %c0_0 = arith.constant 0 : index
    %1 = vector.load %arg7[%c0, %c0_0] : memref<32x32xf32, #tpu.memory_space<vmem>>, vector<32x32xf32>
    tpu.vector_store %arg7[%c0, %c0_0], %0 {strides = array<i32>} : memref<32x32xf32, #tpu.memory_space<vmem>>, vector<32x32xf32>,
    %cst_1 = arith.constant 0.000000e+00 : f32
    %2 = vector.broadcast %cst_1 : f32 to vector<32x1xf32>
    %c0_2 = arith.constant 0 : index
    %c0_3 = arith.constant 0 : index
    %3 = vector.load %arg8[%c0_2, %c0_3] : memref<32x1xf32, #tpu.memory_space<vmem>>, vector<32x1xf32>
    tpu.vector_store %arg8[%c0_2, %c0_3], %2 {strides = array<i32>} : memref<32x1xf32, #tpu.memory_space<vmem>>, vector<32x1xf32>,
    %c0_4 = arith.constant 0 : index
    %c0_5 = arith.constant 0 : index
    %c0_6 = arith.constant 0 : index
    %4 = vector.load %arg1[%c0_4, %c0_5, %c0_6] : memref<2x32x64xbf16, #tpu.memory_space<vmem>>, vector<1x32x64xbf16>
    %5 = vector.shape_cast %4 : vector<1x32x64xbf16> to vector<32x64xbf16>
    %c0_7 = arith.constant 0 : index
    %c0_8 = arith.constant 0 : index
    %6 = vector.load %arg7[%c0_7, %c0_8] : memref<32x32xf32, #tpu.memory_space<vmem>>, vector<32x32xf32>
    %7 = tpu.transpose %5, [1, 0] : vector<32x64xbf16> -> vector<64x32xbf16>
    %cst_9 = arith.constant dense<0.000000e+00> : vector<32x32xf32>
    %8 = tpu.matmul %5, %7, %cst_9 {dimension_numbers = #tpu.dot_dimension_numbers<[1], [0], [0], [1], [0, 0, 1, 1], [], []>} : vector<32x64xbf16>, vector<64x32xbf16>, vector<32x32xf32> -> vector<32x32xf32>
    %9 = arith.addf %6, %8 : vector<32x32xf32>
    %c0_10 = arith.constant 0 : index
    %c0_11 = arith.constant 0 : index
    %10 = vector.load %arg7[%c0_10, %c0_11] : memref<32x32xf32, #tpu.memory_space<vmem>>, vector<32x32xf32>
    tpu.vector_store %arg7[%c0_10, %c0_11], %9 {strides = array<i32>} : memref<32x32xf32, #tpu.memory_space<vmem>>, vector<32x32xf32>,
    %c0_12 = arith.constant 0 : index
    %c0_13 = arith.constant 0 : index
    %11 = vector.load %arg8[%c0_12, %c0_13] : memref<32x1xf32, #tpu.memory_space<vmem>>, vector<32x1xf32>
    %12 = arith.extf %5 : vector<32x64xbf16> to vector<32x64xf32>
    %cst_14 = arith.constant dense<0.000000e+00> : vector<32xf32>
    %13 = vector.multi_reduction <add>, %12, %cst_14 [1] : vector<32x64xf32> to vector<32xf32>
    %14 = vector.shape_cast %13 : vector<32xf32> to vector<32x1xf32>
    %15 = arith.addf %11, %14 : vector<32x1xf32>
    %c0_15 = arith.constant 0 : index
    %c0_16 = arith.constant 0 : index
    %16 = vector.load %arg8[%c0_15, %c0_16] : memref<32x1xf32, #tpu.memory_space<vmem>>, vector<32x1xf32>
    tpu.vector_store %arg8[%c0_15, %c0_16], %15 {strides = array<i32>} : memref<32x1xf32, #tpu.memory_space<vmem>>, vector<32x1xf32>,
    %c1 = arith.constant 1 : index
    %c0_17 = arith.constant 0 : index
    %c0_18 = arith.constant 0 : index
    %17 = vector.load %arg1[%c1, %c0_17, %c0_18] : memref<2x32x64xbf16, #tpu.memory_space<vmem>>, vector<1x32x64xbf16>
    %18 = vector.shape_cast %17 : vector<1x32x64xbf16> to vector<32x64xbf16>
    %c0_19 = arith.constant 0 : index
    %c0_20 = arith.constant 0 : index
    %19 = vector.load %arg7[%c0_19, %c0_20] : memref<32x32xf32, #tpu.memory_space<vmem>>, vector<32x32xf32>
    %20 = tpu.transpose %18, [1, 0] : vector<32x64xbf16> -> vector<64x32xbf16>
    %cst_21 = arith.constant dense<0.000000e+00> : vector<32x32xf32>
    %21 = tpu.matmul %18, %20, %cst_21 {dimension_numbers = #tpu.dot_dimension_numbers<[1], [0], [0], [1], [0, 0, 1, 1], [], []>} : vector<32x64xbf16>, vector<64x32xbf16>, vector<32x32xf32> -> vector<32x32xf32>
    %22 = arith.addf %19, %21 : vector<32x32xf32>
    %c0_22 = arith.constant 0 : index
    %c0_23 = arith.constant 0 : index
    %23 = vector.load %arg7[%c0_22, %c0_23] : memref<32x32xf32, #tpu.memory_space<vmem>>, vector<32x32xf32>
    tpu.vector_store %arg7[%c0_22, %c0_23], %22 {strides = array<i32>} : memref<32x32xf32, #tpu.memory_space<vmem>>, vector<32x32xf32>,
    %c0_24 = arith.constant 0 : index
    %c0_25 = arith.constant 0 : index
    %24 = vector.load %arg8[%c0_24, %c0_25] : memref<32x1xf32, #tpu.memory_space<vmem>>, vector<32x1xf32>
    %25 = arith.extf %18 : vector<32x64xbf16> to vector<32x64xf32>
    %cst_26 = arith.constant dense<0.000000e+00> : vector<32xf32>
    %26 = vector.multi_reduction <add>, %25, %cst_26 [1] : vector<32x64xf32> to vector<32xf32>
    %27 = vector.shape_cast %26 : vector<32xf32> to vector<32x1xf32>
    %28 = arith.addf %24, %27 : vector<32x1xf32>
    %c0_27 = arith.constant 0 : index
    %c0_28 = arith.constant 0 : index
    %29 = vector.load %arg8[%c0_27, %c0_28] : memref<32x1xf32, #tpu.memory_space<vmem>>, vector<32x1xf32>
    tpu.vector_store %arg8[%c0_27, %c0_28], %28 {strides = array<i32>} : memref<32x1xf32, #tpu.memory_space<vmem>>, vector<32x1xf32>,
    %c0_29 = arith.constant 0 : index
    %c0_30 = arith.constant 0 : index
    %30 = vector.load %arg8[%c0_29, %c0_30] : memref<32x1xf32, #tpu.memory_space<vmem>>, vector<32x1xf32>
    %cst_31 = arith.constant 7.812500e-03 : f32
    %31 = vector.broadcast %cst_31 : f32 to vector<32x1xf32>
    %32 = arith.mulf %30, %31 : vector<32x1xf32>
    %33 = tpu.iota {dimensions = array<i32: 0>} : vector<32x32xi32>
    %34 = tpu.iota {dimensions = array<i32: 1>} : vector<32x32xi32>
    %35 = arith.cmpi eq, %33, %34 : vector<32x32xi32>
    %36 = arith.extui %35 : vector<32x32xi1> to vector<32x32xi32>
    %37 = arith.sitofp %36 : vector<32x32xi32> to vector<32x32xf32>
    %38 = vector.broadcast %32 : vector<32x1xf32> to vector<32x32xf32>
    %39 = arith.mulf %37, %38 : vector<32x32xf32>
    %cst_32 = arith.constant dense<0.000000e+00> : vector<32xf32>
    %40 = vector.multi_reduction <add>, %39, %cst_32 [0] : vector<32x32xf32> to vector<32xf32>
    %41 = vector.shape_cast %40 : vector<32xf32> to vector<1x32xf32>
    %c0_33 = arith.constant 0 : index
    %c0_34 = arith.constant 0 : index
    %42 = vector.load %arg7[%c0_33, %c0_34] : memref<32x32xf32, #tpu.memory_space<vmem>>, vector<32x32xf32>
    %cst_35 = arith.constant 7.812500e-03 : f32
    %43 = vector.broadcast %cst_35 : f32 to vector<32x32xf32>
    %44 = arith.mulf %42, %43 : vector<32x32xf32>
    %45 = vector.broadcast %32 : vector<32x1xf32> to vector<32x32xf32>
    %46 = vector.broadcast %41 : vector<1x32xf32> to vector<32x32xf32>
    %47 = arith.mulf %45, %46 : vector<32x32xf32>
    %48 = arith.subf %44, %47 : vector<32x32xf32>
    %cst_36 = arith.constant 9.99999974E-6 : f32
    %49 = vector.broadcast %cst_36 : f32 to vector<32x32xf32>
    %50 = arith.mulf %49, %37 : vector<32x32xf32>
    %51 = arith.addf %48, %50 : vector<32x32xf32>
    %52 = arith.mulf %51, %37 : vector<32x32xf32>
    %cst_37 = arith.constant dense<0.000000e+00> : vector<32xf32>
    %53 = vector.multi_reduction <add>, %52, %cst_37 [1] : vector<32x32xf32> to vector<32xf32>
    %54 = vector.shape_cast %53 : vector<32xf32> to vector<32x1xf32>
    %cst_38 = arith.constant dense<0.000000e+00> : vector<1xf32>
    %55 = vector.multi_reduction <add>, %54, %cst_38 [0] : vector<32x1xf32> to vector<1xf32>
    %56 = vector.shape_cast %55 : vector<1xf32> to vector<1x1xf32>
    %cst_39 = arith.constant 9.99999974E-6 : f32
    %57 = vector.broadcast %cst_39 : f32 to vector<1x1xf32>
    %58 = arith.maximumf %56, %57 : vector<1x1xf32>
    %cst_40 = arith.constant 1.000000e+00 : f32
    %59 = vector.broadcast %cst_40 : f32 to vector<1x1xf32>
    %60 = arith.divf %59, %58 : vector<1x1xf32>
    %61 = vector.broadcast %60 : vector<1x1xf32> to vector<32x32xf32>
    %62 = arith.mulf %51, %61 : vector<32x32xf32>
    %cst_41 = arith.constant dense<0.000000e+00> : vector<32x32xf32>
    %63 = tpu.matmul %37, %37, %cst_41 {dimension_numbers = #tpu.dot_dimension_numbers<[1], [0], [0], [1], [0, 0, 1, 1], [], []>} : vector<32x32xf32>, vector<32x32xf32>, vector<32x32xf32> -> vector<32x32xf32>
    %cst_42 = arith.constant dense<0.000000e+00> : vector<32x32xf32>
    %64 = tpu.matmul %63, %37, %cst_42 {dimension_numbers = #tpu.dot_dimension_numbers<[1], [0], [0], [1], [0, 0, 1, 1], [], []>} : vector<32x32xf32>, vector<32x32xf32>, vector<32x32xf32> -> vector<32x32xf32>
    %cst_43 = arith.constant 1.500000e+00 : f32
    %65 = vector.broadcast %cst_43 : f32 to vector<32x32xf32>
    %66 = arith.mulf %65, %37 : vector<32x32xf32>
    %cst_44 = arith.constant dense<0.000000e+00> : vector<32x32xf32>
    %67 = tpu.matmul %64, %62, %cst_44 {dimension_numbers = #tpu.dot_dimension_numbers<[1], [0], [0], [1], [0, 0, 1, 1], [], []>} : vector<32x32xf32>, vector<32x32xf32>, vector<32x32xf32> -> vector<32x32xf32>
    %cst_45 = arith.constant 5.000000e-01 : f32
    %68 = vector.broadcast %cst_45 : f32 to vector<32x32xf32>
    %69 = arith.mulf %68, %67 : vector<32x32xf32>
    %70 = arith.subf %66, %69 : vector<32x32xf32>
    %cst_46 = arith.constant dense<0.000000e+00> : vector<32x32xf32>
    %71 = tpu.matmul %70, %70, %cst_46 {dimension_numbers = #tpu.dot_dimension_numbers<[1], [0], [0], [1], [0, 0, 1, 1], [], []>} : vector<32x32xf32>, vector<32x32xf32>, vector<32x32xf32> -> vector<32x32xf32>
    %cst_47 = arith.constant dense<0.000000e+00> : vector<32x32xf32>
    %72 = tpu.matmul %71, %70, %cst_47 {dimension_numbers = #tpu.dot_dimension_numbers<[1], [0], [0], [1], [0, 0, 1, 1], [], []>} : vector<32x32xf32>, vector<32x32xf32>, vector<32x32xf32> -> vector<32x32xf32>
    %cst_48 = arith.constant 1.500000e+00 : f32
    %73 = vector.broadcast %cst_48 : f32 to vector<32x32xf32>
    %74 = arith.mulf %73, %70 : vector<32x32xf32>
    %cst_49 = arith.constant dense<0.000000e+00> : vector<32x32xf32>
    %75 = tpu.matmul %72, %62, %cst_49 {dimension_numbers = #tpu.dot_dimension_numbers<[1], [0], [0], [1], [0, 0, 1, 1], [], []>} : vector<32x32xf32>, vector<32x32xf32>, vector<32x32xf32> -> vector<32x32xf32>
    %cst_50 = arith.constant 5.000000e-01 : f32
    %76 = vector.broadcast %cst_50 : f32 to vector<32x32xf32>
    %77 = arith.mulf %76, %75 : vector<32x32xf32>
    %78 = arith.subf %74, %77 : vector<32x32xf32>
    %cst_51 = arith.constant dense<0.000000e+00> : vector<32x32xf32>
    %79 = tpu.matmul %78, %78, %cst_51 {dimension_numbers = #tpu.dot_dimension_numbers<[1], [0], [0], [1], [0, 0, 1, 1], [], []>} : vector<32x32xf32>, vector<32x32xf32>, vector<32x32xf32> -> vector<32x32xf32>
    %cst_52 = arith.constant dense<0.000000e+00> : vector<32x32xf32>
    %80 = tpu.matmul %79, %78, %cst_52 {dimension_numbers = #tpu.dot_dimension_numbers<[1], [0], [0], [1], [0, 0, 1, 1], [], []>} : vector<32x32xf32>, vector<32x32xf32>, vector<32x32xf32> -> vector<32x32xf32>
    %cst_53 = arith.constant 1.500000e+00 : f32
    %81 = vector.broadcast %cst_53 : f32 to vector<32x32xf32>
    %82 = arith.mulf %81, %78 : vector<32x32xf32>
    %cst_54 = arith.constant dense<0.000000e+00> : vector<32x32xf32>
    %83 = tpu.matmul %80, %62, %cst_54 {dimension_numbers = #tpu.dot_dimension_numbers<[1], [0], [0], [1], [0, 0, 1, 1], [], []>} : vector<32x32xf32>, vector<32x32xf32>, vector<32x32xf32> -> vector<32x32xf32>
    %cst_55 = arith.constant 5.000000e-01 : f32
    %84 = vector.broadcast %cst_55 : f32 to vector<32x32xf32>
    %85 = arith.mulf %84, %83 : vector<32x32xf32>
    %86 = arith.subf %82, %85 : vector<32x32xf32>
    %cst_56 = arith.constant dense<0.000000e+00> : vector<32x32xf32>
    %87 = tpu.matmul %86, %86, %cst_56 {dimension_numbers = #tpu.dot_dimension_numbers<[1], [0], [0], [1], [0, 0, 1, 1], [], []>} : vector<32x32xf32>, vector<32x32xf32>, vector<32x32xf32> -> vector<32x32xf32>
    %cst_57 = arith.constant dense<0.000000e+00> : vector<32x32xf32>
    %88 = tpu.matmul %87, %86, %cst_57 {dimension_numbers = #tpu.dot_dimension_numbers<[1], [0], [0], [1], [0, 0, 1, 1], [], []>} : vector<32x32xf32>, vector<32x32xf32>, vector<32x32xf32> -> vector<32x32xf32>
    %cst_58 = arith.constant 1.500000e+00 : f32
    %89 = vector.broadcast %cst_58 : f32 to vector<32x32xf32>
    %90 = arith.mulf %89, %86 : vector<32x32xf32>
    %cst_59 = arith.constant dense<0.000000e+00> : vector<32x32xf32>
    %91 = tpu.matmul %88, %62, %cst_59 {dimension_numbers = #tpu.dot_dimension_numbers<[1], [0], [0], [1], [0, 0, 1, 1], [], []>} : vector<32x32xf32>, vector<32x32xf32>, vector<32x32xf32> -> vector<32x32xf32>
    %cst_60 = arith.constant 5.000000e-01 : f32
    %92 = vector.broadcast %cst_60 : f32 to vector<32x32xf32>
    %93 = arith.mulf %92, %91 : vector<32x32xf32>
    %94 = arith.subf %90, %93 : vector<32x32xf32>
    %cst_61 = arith.constant dense<0.000000e+00> : vector<32x32xf32>
    %95 = tpu.matmul %94, %94, %cst_61 {dimension_numbers = #tpu.dot_dimension_numbers<[1], [0], [0], [1], [0, 0, 1, 1], [], []>} : vector<32x32xf32>, vector<32x32xf32>, vector<32x32xf32> -> vector<32x32xf32>
    %cst_62 = arith.constant dense<0.000000e+00> : vector<32x32xf32>
    %96 = tpu.matmul %95, %94, %cst_62 {dimension_numbers = #tpu.dot_dimension_numbers<[1], [0], [0], [1], [0, 0, 1, 1], [], []>} : vector<32x32xf32>, vector<32x32xf32>, vector<32x32xf32> -> vector<32x32xf32>
    %cst_63 = arith.constant 1.500000e+00 : f32
    %97 = vector.broadcast %cst_63 : f32 to vector<32x32xf32>
    %98 = arith.mulf %97, %94 : vector<32x32xf32>
    %cst_64 = arith.constant dense<0.000000e+00> : vector<32x32xf32>
    %99 = tpu.matmul %96, %62, %cst_64 {dimension_numbers = #tpu.dot_dimension_numbers<[1], [0], [0], [1], [0, 0, 1, 1], [], []>} : vector<32x32xf32>, vector<32x32xf32>, vector<32x32xf32> -> vector<32x32xf32>
    %cst_65 = arith.constant 5.000000e-01 : f32
    %100 = vector.broadcast %cst_65 : f32 to vector<32x32xf32>
    %101 = arith.mulf %100, %99 : vector<32x32xf32>
    %102 = arith.subf %98, %101 : vector<32x32xf32>
    %103 = math.sqrt %60 : vector<1x1xf32>
    %104 = vector.broadcast %103 : vector<1x1xf32> to vector<32x32xf32>
    %105 = arith.mulf %102, %104 : vector<32x32xf32>
    %c0_66 = arith.constant 0 : index
    %c0_67 = arith.constant 0 : index
    %c0_68 = arith.constant 0 : index
    %106 = vector.load %arg2[%c0_66, %c0_67, %c0_68] : memref<1x32x1xf32, #tpu.memory_space<vmem>>, vector<1x32x1xf32>
    %107 = vector.shape_cast %106 : vector<1x32x1xf32> to vector<32x1xf32>
    %108 = vector.broadcast %107 : vector<32x1xf32> to vector<32x32xf32>
    %109 = arith.mulf %108, %105 : vector<32x32xf32>
    %c0_69 = arith.constant 0 : index
    %c0_70 = arith.constant 0 : index
    %c0_71 = arith.constant 0 : index
    %110 = vector.load %arg3[%c0_69, %c0_70, %c0_71] : memref<1x32x1xf32, #tpu.memory_space<vmem>>, vector<1x32x1xf32>
    %111 = vector.shape_cast %110 : vector<1x32x1xf32> to vector<32x1xf32>
    %112 = vector.broadcast %41 : vector<1x32xf32> to vector<32x32xf32>
    %113 = arith.mulf %109, %112 : vector<32x32xf32>
    %cst_72 = arith.constant dense<0.000000e+00> : vector<32xf32>
    %114 = vector.multi_reduction <add>, %113, %cst_72 [1] : vector<32x32xf32> to vector<32xf32>
    %115 = vector.shape_cast %114 : vector<32xf32> to vector<32x1xf32>
    %116 = arith.subf %111, %115 : vector<32x1xf32>
    %117 = arith.truncf %109 : vector<32x32xf32> to vector<32x32xbf16>
    %c0_73 = arith.constant 0 : index
    %c0_74 = arith.constant 0 : index
    %c0_75 = arith.constant 0 : index
    %118 = vector.load %arg1[%c0_73, %c0_74, %c0_75] : memref<2x32x64xbf16, #tpu.memory_space<vmem>>, vector<1x32x64xbf16>
    %119 = vector.shape_cast %118 : vector<1x32x64xbf16> to vector<32x64xbf16>
    %cst_76 = arith.constant dense<0.000000e+00> : vector<32x64xf32>
    %120 = tpu.matmul %117, %119, %cst_76 {dimension_numbers = #tpu.dot_dimension_numbers<[1], [0], [0], [1], [0, 0, 1, 1], [], []>} : vector<32x32xbf16>, vector<32x64xbf16>, vector<32x64xf32> -> vector<32x64xf32>
    %121 = vector.broadcast %116 : vector<32x1xf32> to vector<32x64xf32>
    %122 = arith.addf %120, %121 : vector<32x64xf32>
    %123 = arith.truncf %122 : vector<32x64xf32> to vector<32x64xbf16>
    %c0_77 = arith.constant 0 : index
    %c0_78 = arith.constant 0 : index
    %c0_79 = arith.constant 0 : index
    %124 = vector.load %arg4[%c0_77, %c0_78, %c0_79] : memref<2x32x64xbf16, #tpu.memory_space<vmem>>, vector<1x32x64xbf16>
    %125 = vector.shape_cast %124 : vector<1x32x64xbf16> to vector<32x64xbf16>
    %126 = vector.shape_cast %123 : vector<32x64xbf16> to vector<1x32x64xbf16>
    tpu.vector_store %arg4[%c0_77, %c0_78, %c0_79], %126 {strides = array<i32>} : memref<2x32x64xbf16, #tpu.memory_space<vmem>>, vector<1x32x64xbf16>,
    %c1_80 = arith.constant 1 : index
    %c0_81 = arith.constant 0 : index
    %c0_82 = arith.constant 0 : index
    %127 = vector.load %arg1[%c1_80, %c0_81, %c0_82] : memref<2x32x64xbf16, #tpu.memory_space<vmem>>, vector<1x32x64xbf16>
    %128 = vector.shape_cast %127 : vector<1x32x64xbf16> to vector<32x64xbf16>
    %cst_83 = arith.constant dense<0.000000e+00> : vector<32x64xf32>
    %129 = tpu.matmul %117, %128, %cst_83 {dimension_numbers = #tpu.dot_dimension_numbers<[1], [0], [0], [1], [0, 0, 1, 1], [], []>} : vector<32x32xbf16>, vector<32x64xbf16>, vector<32x64xf32> -> vector<32x64xf32>
    %130 = vector.broadcast %116 : vector<32x1xf32> to vector<32x64xf32>
    %131 = arith.addf %129, %130 : vector<32x64xf32>
    %132 = arith.truncf %131 : vector<32x64xf32> to vector<32x64xbf16>
    %c1_84 = arith.constant 1 : index
    %c0_85 = arith.constant 0 : index
    %c0_86 = arith.constant 0 : index
    %133 = vector.load %arg4[%c1_84, %c0_85, %c0_86] : memref<2x32x64xbf16, #tpu.memory_space<vmem>>, vector<1x32x64xbf16>
    %134 = vector.shape_cast %133 : vector<1x32x64xbf16> to vector<32x64xbf16>
    %135 = vector.shape_cast %132 : vector<32x64xbf16> to vector<1x32x64xbf16>
    tpu.vector_store %arg4[%c1_84, %c0_85, %c0_86], %135 {strides = array<i32>} : memref<2x32x64xbf16, #tpu.memory_space<vmem>>, vector<1x32x64xbf16>,
    %c0_87 = arith.constant 0 : index
    %c0_88 = arith.constant 0 : index
    %c0_89 = arith.constant 0 : index
    %136 = vector.load %arg5[%c0_87, %c0_88, %c0_89] : memref<1x32x1xf32, #tpu.memory_space<vmem>>, vector<1x32x1xf32>
    %137 = vector.shape_cast %136 : vector<1x32x1xf32> to vector<32x1xf32>
    %138 = vector.shape_cast %32 : vector<32x1xf32> to vector<1x32x1xf32>
    tpu.vector_store %arg5[%c0_87, %c0_88, %c0_89], %138 {strides = array<i32>} : memref<1x32x1xf32, #tpu.memory_space<vmem>>, vector<1x32x1xf32>,
    %c0_90 = arith.constant 0 : index
    %c0_91 = arith.constant 0 : index
    %c0_92 = arith.constant 0 : index
    %139 = vector.load %arg6[%c0_90, %c0_91, %c0_92] : memref<1x32x32xf32, #tpu.memory_space<vmem>>, vector<1x32x32xf32>
    %140 = vector.shape_cast %139 : vector<1x32x32xf32> to vector<32x32xf32>
    %141 = vector.shape_cast %105 : vector<32x32xf32> to vector<1x32x32xf32>
    tpu.vector_store %arg6[%c0_90, %c0_91, %c0_92], %141 {strides = array<i32>} : memref<1x32x32xf32, #tpu.memory_space<vmem>>, vector<1x32x32xf32>,
    return
  }
  func.func @transform_0(%arg0: i32) -> (i32, i32, i32) {
    %c0_i32 = arith.constant 0 : i32
    %c0_i32_0 = arith.constant 0 : i32
    %c0_i32_1 = arith.constant 0 : i32
    return %c0_i32, %arg0, %c0_i32_0 : i32, i32, i32
  }
  func.func @transform_1(%arg0: i32) -> (i32, i32, i32) {
    %c0_i32 = arith.constant 0 : i32
    %c0_i32_0 = arith.constant 0 : i32
    %c0_i32_1 = arith.constant 0 : i32
    return %arg0, %c0_i32, %c0_i32_0 : i32, i32, i32
  }
  func.func @transform_2(%arg0: i32) -> (i32, i32, i32) {
    %c0_i32 = arith.constant 0 : i32
    %c0_i32_0 = arith.constant 0 : i32
    %c0_i32_1 = arith.constant 0 : i32
    return %arg0, %c0_i32, %c0_i32_0 : i32, i32, i32
  }
  func.func @transform_3(%arg0: i32) -> (i32, i32, i32) {
    %c0_i32 = arith.constant 0 : i32
    %c0_i32_0 = arith.constant 0 : i32
    %c0_i32_1 = arith.constant 0 : i32
    return %c0_i32, %arg0, %c0_i32_0 : i32, i32, i32
  }
  func.func @transform_4(%arg0: i32) -> (i32, i32, i32) {
    %c0_i32 = arith.constant 0 : i32
    %c0_i32_0 = arith.constant 0 : i32
    %c0_i32_1 = arith.constant 0 : i32
    return %arg0, %c0_i32, %c0_i32_0 : i32, i32, i32
  }
  func.func @transform_5(%arg0: i32) -> (i32, i32, i32) {
    %c0_i32 = arith.constant 0 : i32
    %c0_i32_0 = arith.constant 0 : i32
    %c0_i32_1 = arith.constant 0 : i32
    return %arg0, %c0_i32, %c0_i32_0 : i32, i32, i32
  }
}

</mosaic_0001>

<bundles_post_ra>
// kernel: squeeze.0
= control target key start
LH: loop header
LB: loop body
LE: loop exit
PB: predicated region body
PF: predicated region fallthrough
CT: control target
= control target key end

     0   :  { %s515_s8 = smov 125   ;;  %s516_s9 = smov 126   ;;  %vm8_vm0 = vcmask 7168   ;;  %s846_s0 = inlined_call_operand.vmem [shape: f32[64], index: 0, kind: input, shape index: {}]   ;;  %s847_s1 = inlined_call_operand.vmem [shape: f32[2,32,1], index: 1, kind: output, shape index: {}]  }
   0x1   :  { %v5_v0 = vld [vmem:[%s846_s0] sm:$0x1]  ;;  %s514_s0 = smov 127   ;;  %s517_s10 = smov 124  }
   0x2   :  { %6 = vst [vmem:[#allocation0] sm:$0x1] %v5_v0  ;;  %s518_s11 = smov 123   ;;  %s519_s12 = smov 122  }
   0x3   :  { %s520_s13 = smov 121   ;;  %s521_s14 = smov 120  }
   0x4   :  { %s522_s15 = smov 119   ;;  %s523_s16 = smov 118  }
   0x5   :  { %s524_s17 = smov 117   ;;  %s525_s18 = smov 116  }
   0x6   :  { %s526_s19 = smov 115   ;;  %s527_s20 = smov 114  }
   0x7   :  { %s528_s21 = smov 113   ;;  %s529_s22 = smov 112  }
   0x8   :  { %s530_s23 = smov 111   ;;  %s531_s24 = smov 110  }
   0x9   :  { %v10_v1 = vld [vmem:[#allocation0] sm:$0x1]   ;;  %s532_s25 = smov 109   ;;  %s533_s26 = smov 108  }
   0xa   :  { %v22_v2 = vld [vmem:[#allocation0] sm:$0x1]   ;;  %11 = vrot.lane.b32.xlu0 %v10_v1, %s514_s0  ;;  %s534_s27 = smov 107   ;;  %s535_s28 = smov 106  }
   0xb   :  { %23 = vrot.lane.b32.xlu1 %v22_v2, %s515_s8  ;;  %v16_v3 = vld [vmem:[#allocation0] sm:$0x1]   ;;  %s536_s29 = smov 105   ;;  %s537_s30 = smov 104  }
   0xc   :  { %v28_v4 = vld [vmem:[#allocation0] sm:$0x1]   ;;  %s538_s2 = smov 103   ;;  %s539_s3 = smov 102  }
   0xd   :  { %v34_v5 = vld [vmem:[#allocation0] sm:$0x1]   ;;  %s540_s4 = smov 101   ;;  %s541_s5 = smov 100  }
   0xe   :  { %17 = vrot.lane.b32.xlu0 %v16_v3, %s516_s9  ;;  %v40_v6 = vld [vmem:[#allocation0] sm:$0x1]   ;;  %s542_s6 = smov 99   ;;  %s543_s7 = smov 98  }
   0xf   :  { %29 = vrot.lane.b32.xlu1 %v28_v4, %s517_s10  ;;  %v46_v7 = vld [vmem:[#allocation0] sm:$0x1]   ;;  %s544_s0 = smov 97   ;;  %s545_s8 = smov 96  }
  0x10   :  { %v52_v8 = vld [vmem:[#allocation0] sm:$0x1]   ;;  %s546_s9 = smov 95   ;;  %s547_s10 = smov 94  }
  0x11   :  { %v58_v9 = vld [vmem:[#allocation0] sm:$0x1]  }
  0x12   :  { %35 = vrot.lane.b32.xlu0 %v34_v5, %s518_s11  ;;  %v64_v10 = vld [vmem:[#allocation0] sm:$0x1]   ;;  %s548_s11 = smov 93  }
  0x13   :  { %41 = vrot.lane.b32.xlu1 %v40_v6, %s519_s12  ;;  %v70_v11 = vld [vmem:[#allocation0] sm:$0x1]   ;;  %s549_s12 = smov 92  }
  0x14   :  { %v76_v12 = vld [vmem:[#allocation0] sm:$0x1]  }
  0x15   :  { %v82_v13 = vld [vmem:[#allocation0] sm:$0x1]  }
  0x16   :  { %47 = vrot.lane.b32.xlu0 %v46_v7, %s520_s13  ;;  %v88_v14 = vld [vmem:[#allocation0] sm:$0x1]   ;;  %s550_s13 = smov 91  }
  0x17   :  { %53 = vrot.lane.b32.xlu1 %v52_v8, %s521_s14  ;;  %v94_v15 = vld [vmem:[#allocation0] sm:$0x1]   ;;  %s551_s14 = smov 90  }
  0x18   :  { %v100_v16 = vld [vmem:[#allocation0] sm:$0x1]  }
  0x19   :  { %v106_v17 = vld [vmem:[#allocation0] sm:$0x1]  }
  0x1a   :  { %59 = vrot.lane.b32.xlu0 %v58_v9, %s522_s15  ;;  %v112_v18 = vld [vmem:[#allocation0] sm:$0x1]   ;;  %s552_s15 = smov 89  }
  0x1b   :  { %65 = vrot.lane.b32.xlu1 %v64_v10, %s523_s16  ;;  %v118_v19 = vld [vmem:[#allocation0] sm:$0x1]   ;;  %s553_s16 = smov 88  }
  0x1c   :  { %v124_v20 = vld [vmem:[#allocation0] sm:$0x1]  }
  0x1d   :  { %v130_v21 = vld [vmem:[#allocation0] sm:$0x1]  }
  0x1e   :  { %71 = vrot.lane.b32.xlu0 %v70_v11, %s524_s17  ;;  %v136_v22 = vld [vmem:[#allocation0] sm:$0x1]   ;;  %s554_s17 = smov 87  }
  0x1f   :  { %77 = vrot.lane.b32.xlu1 %v76_v12, %s525_s18  ;;  %v142_v23 = vld [vmem:[#allocation0] sm:$0x1]   ;;  %s555_s18 = smov 86  }
  0x20   :  { %v148_v24 = vld [vmem:[#allocation0] sm:$0x1]  }
  0x21   :  { %v154_v25 = vld [vmem:[#allocation0] sm:$0x1]  }
  0x22   :  { %83 = vrot.lane.b32.xlu0 %v82_v13, %s526_s19  ;;  %v160_v26 = vld [vmem:[#allocation0] sm:$0x1]   ;;  %s556_s19 = smov 85  }
  0x23   :  { %89 = vrot.lane.b32.xlu1 %v88_v14, %s527_s20  ;;  %v166_v27 = vld [vmem:[#allocation0] sm:$0x1]   ;;  %s557_s20 = smov 84  }
  0x24   :  { %v172_v28 = vld [vmem:[#allocation0] sm:$0x1]  }
  0x25   :  { %v178_v29 = vld [vmem:[#allocation0] sm:$0x1]  }
  0x26   :  { %95 = vrot.lane.b32.xlu0 %v94_v15, %s528_s21  ;;  %v184_v30 = vld [vmem:[#allocation0] sm:$0x1]   ;;  %s558_s21 = smov 83  }
  0x27   :  { %101 = vrot.lane.b32.xlu1 %v100_v16, %s529_s22  ;;  %v190_v31 = vld [vmem:[#allocation0] sm:$0x1]   ;;  %s559_s22 = smov 82  }
  0x28   :  { %v196_v32 = vld [vmem:[#allocation0] sm:$0x1]  }
  0x29   :  { %v202_v33 = vld [vmem:[#allocation0] sm:$0x1]  }
  0x2a   :  { %107 = vrot.lane.b32.xlu0 %v106_v17, %s530_s23  ;;  %v208_v34 = vld [vmem:[#allocation0] sm:$0x1]   ;;  %s560_s23 = smov 81  }
  0x2b   :  { %113 = vrot.lane.b32.xlu1 %v112_v18, %s531_s24  ;;  %v214_v35 = vld [vmem:[#allocation0] sm:$0x1]   ;;  %s561_s24 = smov 80  }
  0x2c   :  { %v220_v36 = vld [vmem:[#allocation0] sm:$0x1]  }
  0x2d   :  { %v226_v37 = vld [vmem:[#allocation0] sm:$0x1]  }
  0x2e   :  { %119 = vrot.lane.b32.xlu0 %v118_v19, %s532_s25  ;;  %v232_v38 = vld [vmem:[#allocation0] sm:$0x1]   ;;  %s562_s25 = smov 79  }
  0x2f   :  { %125 = vrot.lane.b32.xlu1 %v124_v20, %s533_s26  ;;  %v238_v39 = vld [vmem:[#allocation0] sm:$0x1]   ;;  %s563_s26 = smov 78  }
  0x30   :  { %v244_v40 = vld [vmem:[#allocation0] sm:$0x1]  }
  0x31   :  { %v250_v41 = vld [vmem:[#allocation0] sm:$0x1]  }
  0x32   :  { %131 = vrot.lane.b32.xlu0 %v130_v21, %s534_s27  ;;  %v256_v42 = vld [vmem:[#allocation0] sm:$0x1]   ;;  %s564_s27 = smov 77  }
  0x33   :  { %137 = vrot.lane.b32.xlu1 %v136_v22, %s535_s28  ;;  %v262_v43 = vld [vmem:[#allocation0] sm:$0x1]   ;;  %s565_s28 = smov 76  }
  0x34   :  { %v268_v44 = vld [vmem:[#allocation0] sm:$0x1]  }
  0x35   :  { %v274_v45 = vld [vmem:[#allocation0] sm:$0x1]  }
  0x36   :  { %143 = vrot.lane.b32.xlu0 %v142_v23, %s536_s29  ;;  %v280_v46 = vld [vmem:[#allocation0] sm:$0x1]   ;;  %s566_s29 = smov 75  }
  0x37   :  { %149 = vrot.lane.b32.xlu1 %v148_v24, %s537_s30  ;;  %v286_v47 = vld [vmem:[#allocation0] sm:$0x1]   ;;  %s567_s30 = smov 74  }
  0x38   :  { %v292_v48 = vld [vmem:[#allocation0] sm:$0x1]  }
  0x39   :  { %v298_v49 = vld [vmem:[#allocation0] sm:$0x1]  }
  0x3a   :  { %155 = vrot.lane.b32.xlu0 %v154_v25, %s538_s2  ;;  %v304_v50 = vld [vmem:[#allocation0] sm:$0x1]   ;;  %s568_s2 = smov 73  }
  0x3b   :  { %161 = vrot.lane.b32.xlu1 %v160_v26, %s539_s3  ;;  %v310_v51 = vld [vmem:[#allocation0] sm:$0x1]   ;;  %s569_s3 = smov 72  }
  0x3c   :  { %v316_v52 = vld [vmem:[#allocation0] sm:$0x1]  }
  0x3d   :  { %v322_v53 = vld [vmem:[#allocation0] sm:$0x1]  }
  0x3e   :  { %167 = vrot.lane.b32.xlu0 %v166_v27, %s540_s4  ;;  %v328_v54 = vld [vmem:[#allocation0] sm:$0x1]  }
  0x3f   :  { %173 = vrot.lane.b32.xlu1 %v172_v28, %s541_s5  ;;  %v334_v55 = vld [vmem:[#allocation0] sm:$0x1]  }
  0x40   :  { %v340_v56 = vld [vmem:[#allocation0] sm:$0x1]  }
  0x41   :  { %v346_v57 = vld [vmem:[#allocation0] sm:$0x1]  }
  0x42   :  { %179 = vrot.lane.b32.xlu0 %v178_v29, %s542_s6  ;;  %v352_v58 = vld [vmem:[#allocation0] sm:$0x1]   ;;  %s570_s6 = smov 71  }
  0x43   :  { %185 = vrot.lane.b32.xlu1 %v184_v30, %s543_s7  ;;  %v7_v59 = vld [vmem:[#allocation0] sm:$0x1]   ;;  %s571_s7 = smov 70  }
  0x44   :  { %9 = vst.msk [vmem:[%s847_s1] sm:$0x1] %vm8_vm0, %v7_v59   ;;  %v358_v60 = vld [vmem:[#allocation0] sm:$0x1]  }
  0x45   :  { %v364_v61 = vld [vmem:[#allocation0] sm:$0x1]  }
  0x46   :  { %191 = vrot.lane.b32.xlu0 %v190_v31, %s544_s0  ;;  %v370_v0 = vld [vmem:[#allocation0] sm:$0x1]  }
  0x47   :  { %197 = vrot.lane.b32.xlu1 %v196_v32, %s545_s8  ;;  %v376_v1 = vld [vmem:[#allocation0] sm:$0x1]  }
  0x48   :  { %v382_v4 = vld [vmem:[#allocation0] sm:$0x1]  }
  0x4a   :  { %203 = vrot.lane.b32.xlu0 %v202_v33, %s546_s9 }
  0x4b   :  { %209 = vrot.lane.b32.xlu1 %v208_v34, %s547_s10 }
  0x4e   :  { %215 = vrot.lane.b32.xlu0 %v214_v35, %s548_s11  ;;  %s572_s11 = smov 69  }
  0x4f   :  { %221 = vrot.lane.b32.xlu1 %v220_v36, %s549_s12  ;;  %s573_s12 = smov 68  }
  0x52   :  { %227 = vrot.lane.b32.xlu0 %v226_v37, %s550_s13 }
  0x53   :  { %233 = vrot.lane.b32.xlu1 %v232_v38, %s551_s14 }
  0x56   :  { %239 = vrot.lane.b32.xlu0 %v238_v39, %s552_s15 }
  0x57   :  { %245 = vrot.lane.b32.xlu1 %v244_v40, %s553_s16 }
  0x5a   :  { %251 = vrot.lane.b32.xlu0 %v250_v41, %s554_s17  ;;  %s574_s17 = smov 67  }
  0x5b   :  { %257 = vrot.lane.b32.xlu1 %v256_v42, %s555_s18  ;;  %s575_s18 = smov 66  }
  0x5e   :  { %263 = vrot.lane.b32.xlu0 %v262_v43, %s556_s19 }
  0x5f   :  { %269 = vrot.lane.b32.xlu1 %v268_v44, %s557_s20 }
  0x62   :  { %275 = vrot.lane.b32.xlu0 %v274_v45, %s558_s21 }
  0x63   :  { %281 = vrot.lane.b32.xlu1 %v280_v46, %s559_s22 }
  0x66   :  { %287 = vrot.lane.b32.xlu0 %v286_v47, %s560_s23  ;;  %s576_s23 = smov 65  }
  0x67   :  { %293 = vrot.lane.b32.xlu1 %v292_v48, %s561_s24 }
  0x6a   :  { %299 = vrot.lane.b32.xlu0 %v298_v49, %s562_s25 }
  0x6b   :  { %305 = vrot.lane.b32.xlu1 %v304_v50, %s563_s26 }
  0x6e   :  { %311 = vrot.lane.b32.xlu0 %v310_v51, %s564_s27 }
  0x6f   :  { %317 = vrot.lane.b32.xlu1 %v316_v52, %s565_s28 }
  0x72   :  { %323 = vrot.lane.b32.xlu0 %v322_v53, %s566_s29 }
  0x73   :  { %329 = vrot.lane.b32.xlu1 %v328_v54, %s567_s30 }
  0x76   :  { %335 = vrot.lane.b32.xlu0 %v334_v55, %s568_s2 }
  0x77   :  { %341 = vrot.lane.b32.xlu1 %v340_v56, %s569_s3 }
  0x7a   :  { %347 = vrot.lane.b32.xlu0 %v346_v57, %s570_s6 }
  0x7b   :  { %353 = vrot.lane.b32.xlu1 %v352_v58, %s571_s7 }
  0x7c   :  { %v12_v62 = vpop.permute.xlu0 %11  }
  0x7d   :  { %v24_v63 = vpop.permute.xlu1 %23   ;;  %388 = vst.msk [vmem:[%s847_s1 + $0x1] sm:$0x1] %vm8_vm0, %v12_v62  }
  0x7e   :  { %390 = vst.msk [vmem:[%s847_s1 + $0x3] sm:$0x1] %vm8_vm0, %v24_v63   ;;  %359 = vrot.lane.b32.xlu0 %v358_v60, %s572_s11 }
  0x7f   :  { %365 = vrot.lane.b32.xlu1 %v364_v61, %s573_s12 }
  0x80   :  { %v18_v2 = vpop.permute.xlu0 %17  }
  0x81   :  { %v30_v3 = vpop.permute.xlu1 %29   ;;  %389 = vst.msk [vmem:[%s847_s1 + $0x2] sm:$0x1] %vm8_vm0, %v18_v2  }
  0x82   :  { %391 = vst.msk [vmem:[%s847_s1 + $0x4] sm:$0x1] %vm8_vm0, %v30_v3   ;;  %371 = vrot.lane.b32.xlu0 %v370_v0, %s574_s17 }
  0x83   :  { %377 = vrot.lane.b32.xlu1 %v376_v1, %s575_s18 }
  0x84   :  { %v36_v5 = vpop.permute.xlu0 %35  }
  0x85   :  { %v42_v6 = vpop.permute.xlu1 %41   ;;  %392 = vst.msk [vmem:[%s847_s1 + $0x5] sm:$0x1] %vm8_vm0, %v36_v5  }
  0x86   :  { %393 = vst.msk [vmem:[%s847_s1 + $0x6] sm:$0x1] %vm8_vm0, %v42_v6   ;;  %383 = vrot.lane.b32.xlu0 %v382_v4, %s576_s23 }
  0x88   :  { %v48_v7 = vpop.permute.xlu0 %47  }
  0x89   :  { %v54_v8 = vpop.permute.xlu1 %53   ;;  %394 = vst.msk [vmem:[%s847_s1 + $0x7] sm:$0x1] %vm8_vm0, %v48_v7  }
  0x8a   :  { %395 = vst.msk [vmem:[%s847_s1 + $0x8] sm:$0x1] %vm8_vm0, %v54_v8  }
  0x8c   :  { %v60_v9 = vpop.permute.xlu0 %59  }
  0x8d   :  { %v66_v10 = vpop.permute.xlu1 %65   ;;  %396 = vst.msk [vmem:[%s847_s1 + $0x9] sm:$0x1] %vm8_vm0, %v60_v9  }
  0x8e   :  { %397 = vst.msk [vmem:[%s847_s1 + $0xa] sm:$0x1] %vm8_vm0, %v66_v10  }
  0x90   :  { %v72_v11 = vpop.permute.xlu0 %71  }
  0x91   :  { %v78_v12 = vpop.permute.xlu1 %77   ;;  %398 = vst.msk [vmem:[%s847_s1 + $0xb] sm:$0x1] %vm8_vm0, %v72_v11  }
  0x92   :  { %399 = vst.msk [vmem:[%s847_s1 + $0xc] sm:$0x1] %vm8_vm0, %v78_v12  }
  0x94   :  { %v84_v13 = vpop.permute.xlu0 %83  }
  0x95   :  { %v90_v14 = vpop.permute.xlu1 %89   ;;  %400 = vst.msk [vmem:[%s847_s1 + $0xd] sm:$0x1] %vm8_vm0, %v84_v13  }
  0x96   :  { %401 = vst.msk [vmem:[%s847_s1 + $0xe] sm:$0x1] %vm8_vm0, %v90_v14  }
  0x98   :  { %v96_v15 = vpop.permute.xlu0 %95  }
  0x99   :  { %v102_v16 = vpop.permute.xlu1 %101   ;;  %402 = vst.msk [vmem:[%s847_s1 + $0xf] sm:$0x1] %vm8_vm0, %v96_v15  }
  0x9a   :  { %403 = vst.msk [vmem:[%s847_s1 + $0x10] sm:$0x1] %vm8_vm0, %v102_v16  }
  0x9c   :  { %v108_v17 = vpop.permute.xlu0 %107  }
  0x9d   :  { %v114_v18 = vpop.permute.xlu1 %113   ;;  %404 = vst.msk [vmem:[%s847_s1 + $0x11] sm:$0x1] %vm8_vm0, %v108_v17  }
  0x9e   :  { %405 = vst.msk [vmem:[%s847_s1 + $0x12] sm:$0x1] %vm8_vm0, %v114_v18  }
  0xa0   :  { %v120_v19 = vpop.permute.xlu0 %119  }
  0xa1   :  { %v126_v20 = vpop.permute.xlu1 %125   ;;  %406 = vst.msk [vmem:[%s847_s1 + $0x13] sm:$0x1] %vm8_vm0, %v120_v19  }
  0xa2   :  { %407 = vst.msk [vmem:[%s847_s1 + $0x14] sm:$0x1] %vm8_vm0, %v126_v20  }
  0xa4   :  { %v132_v21 = vpop.permute.xlu0 %131  }
  0xa5   :  { %v138_v22 = vpop.permute.xlu1 %137   ;;  %408 = vst.msk [vmem:[%s847_s1 + $0x15] sm:$0x1] %vm8_vm0, %v132_v21  }
  0xa6   :  { %409 = vst.msk [vmem:[%s847_s1 + $0x16] sm:$0x1] %vm8_vm0, %v138_v22  }
  0xa8   :  { %v144_v23 = vpop.permute.xlu0 %143  }
  0xa9   :  { %v150_v24 = vpop.permute.xlu1 %149   ;;  %410 = vst.msk [vmem:[%s847_s1 + $0x17] sm:$0x1] %vm8_vm0, %v144_v23  }
  0xaa   :  { %411 = vst.msk [vmem:[%s847_s1 + $0x18] sm:$0x1] %vm8_vm0, %v150_v24  }
  0xac   :  { %v156_v25 = vpop.permute.xlu0 %155  }
  0xad   :  { %v162_v26 = vpop.permute.xlu1 %161   ;;  %412 = vst.msk [vmem:[%s847_s1 + $0x19] sm:$0x1] %vm8_vm0, %v156_v25  }
  0xae   :  { %413 = vst.msk [vmem:[%s847_s1 + $0x1a] sm:$0x1] %vm8_vm0, %v162_v26  }
  0xb0   :  { %v168_v27 = vpop.permute.xlu0 %167  }
  0xb1   :  { %v174_v28 = vpop.permute.xlu1 %173   ;;  %414 = vst.msk [vmem:[%s847_s1 + $0x1b] sm:$0x1] %vm8_vm0, %v168_v27  }
  0xb2   :  { %415 = vst.msk [vmem:[%s847_s1 + $0x1c] sm:$0x1] %vm8_vm0, %v174_v28  }
  0xb4   :  { %v180_v29 = vpop.permute.xlu0 %179  }
  0xb5   :  { %v186_v30 = vpop.permute.xlu1 %185   ;;  %416 = vst.msk [vmem:[%s847_s1 + $0x1d] sm:$0x1] %vm8_vm0, %v180_v29  }
  0xb6   :  { %417 = vst.msk [vmem:[%s847_s1 + $0x1e] sm:$0x1] %vm8_vm0, %v186_v30  }
  0xb8   :  { %v192_v31 = vpop.permute.xlu0 %191  }
  0xb9   :  { %v198_v32 = vpop.permute.xlu1 %197   ;;  %418 = vst.msk [vmem:[%s847_s1 + $0x1f] sm:$0x1] %vm8_vm0, %v192_v31  }
  0xba   :  { %419 = vst.msk [vmem:[%s847_s1 + $0x20] sm:$0x1] %vm8_vm0, %v198_v32  }
  0xbc   :  { %v204_v33 = vpop.permute.xlu0 %203  }
  0xbd   :  { %v210_v34 = vpop.permute.xlu1 %209   ;;  %420 = vst.msk [vmem:[%s847_s1 + $0x21] sm:$0x1] %vm8_vm0, %v204_v33  }
  0xbe   :  { %421 = vst.msk [vmem:[%s847_s1 + $0x22] sm:$0x1] %vm8_vm0, %v210_v34  }
  0xc0   :  { %v216_v35 = vpop.permute.xlu0 %215  }
  0xc1   :  { %v222_v36 = vpop.permute.xlu1 %221   ;;  %422 = vst.msk [vmem:[%s847_s1 + $0x23] sm:$0x1] %vm8_vm0, %v216_v35  }
  0xc2   :  { %423 = vst.msk [vmem:[%s847_s1 + $0x24] sm:$0x1] %vm8_vm0, %v222_v36  }
  0xc4   :  { %v228_v37 = vpop.permute.xlu0 %227  }
  0xc5   :  { %v234_v38 = vpop.permute.xlu1 %233   ;;  %424 = vst.msk [vmem:[%s847_s1 + $0x25] sm:$0x1] %vm8_vm0, %v228_v37  }
  0xc6   :  { %425 = vst.msk [vmem:[%s847_s1 + $0x26] sm:$0x1] %vm8_vm0, %v234_v38  }
  0xc8   :  { %v240_v39 = vpop.permute.xlu0 %239  }
  0xc9   :  { %v246_v40 = vpop.permute.xlu1 %245   ;;  %426 = vst.msk [vmem:[%s847_s1 + $0x27] sm:$0x1] %vm8_vm0, %v240_v39  }
  0xca   :  { %427 = vst.msk [vmem:[%s847_s1 + $0x28] sm:$0x1] %vm8_vm0, %v246_v40  }
  0xcc   :  { %v252_v41 = vpop.permute.xlu0 %251  }
  0xcd   :  { %v258_v42 = vpop.permute.xlu1 %257   ;;  %428 = vst.msk [vmem:[%s847_s1 + $0x29] sm:$0x1] %vm8_vm0, %v252_v41  }
  0xce   :  { %429 = vst.msk [vmem:[%s847_s1 + $0x2a] sm:$0x1] %vm8_vm0, %v258_v42  }
  0xd0   :  { %v264_v43 = vpop.permute.xlu0 %263  }
  0xd1   :  { %v270_v44 = vpop.permute.xlu1 %269   ;;  %430 = vst.msk [vmem:[%s847_s1 + $0x2b] sm:$0x1] %vm8_vm0, %v264_v43  }
  0xd2   :  { %431 = vst.msk [vmem:[%s847_s1 + $0x2c] sm:$0x1] %vm8_vm0, %v270_v44  }
  0xd4   :  { %v276_v45 = vpop.permute.xlu0 %275  }
  0xd5   :  { %v282_v46 = vpop.permute.xlu1 %281   ;;  %432 = vst.msk [vmem:[%s847_s1 + $0x2d] sm:$0x1] %vm8_vm0, %v276_v45  }
  0xd6   :  { %433 = vst.msk [vmem:[%s847_s1 + $0x2e] sm:$0x1] %vm8_vm0, %v282_v46  }
  0xd8   :  { %v288_v47 = vpop.permute.xlu0 %287  }
  0xd9   :  { %v294_v48 = vpop.permute.xlu1 %293   ;;  %434 = vst.msk [vmem:[%s847_s1 + $0x2f] sm:$0x1] %vm8_vm0, %v288_v47  }
  0xda   :  { %435 = vst.msk [vmem:[%s847_s1 + $0x30] sm:$0x1] %vm8_vm0, %v294_v48  }
  0xdc   :  { %v300_v49 = vpop.permute.xlu0 %299  }
  0xdd   :  { %v306_v50 = vpop.permute.xlu1 %305   ;;  %436 = vst.msk [vmem:[%s847_s1 + $0x31] sm:$0x1] %vm8_vm0, %v300_v49  }
  0xde   :  { %437 = vst.msk [vmem:[%s847_s1 + $0x32] sm:$0x1] %vm8_vm0, %v306_v50  }
  0xe0   :  { %v312_v51 = vpop.permute.xlu0 %311  }
  0xe1   :  { %v318_v52 = vpop.permute.xlu1 %317   ;;  %438 = vst.msk [vmem:[%s847_s1 + $0x33] sm:$0x1] %vm8_vm0, %v312_v51  }
  0xe2   :  { %439 = vst.msk [vmem:[%s847_s1 + $0x34] sm:$0x1] %vm8_vm0, %v318_v52  }
  0xe4   :  { %v324_v53 = vpop.permute.xlu0 %323  }
  0xe5   :  { %v330_v54 = vpop.permute.xlu1 %329   ;;  %440 = vst.msk [vmem:[%s847_s1 + $0x35] sm:$0x1] %vm8_vm0, %v324_v53  }
  0xe6   :  { %441 = vst.msk [vmem:[%s847_s1 + $0x36] sm:$0x1] %vm8_vm0, %v330_v54  }
  0xe8   :  { %v336_v55 = vpop.permute.xlu0 %335  }
  0xe9   :  { %v342_v56 = vpop.permute.xlu1 %341   ;;  %442 = vst.msk [vmem:[%s847_s1 + $0x37] sm:$0x1] %vm8_vm0, %v336_v55  }
  0xea   :  { %443 = vst.msk [vmem:[%s847_s1 + $0x38] sm:$0x1] %vm8_vm0, %v342_v56  }
  0xec   :  { %v348_v57 = vpop.permute.xlu0 %347  }
  0xed   :  { %v354_v58 = vpop.permute.xlu1 %353   ;;  %444 = vst.msk [vmem:[%s847_s1 + $0x39] sm:$0x1] %vm8_vm0, %v348_v57  }
  0xee   :  { %445 = vst.msk [vmem:[%s847_s1 + $0x3a] sm:$0x1] %vm8_vm0, %v354_v58  }
  0xf0   :  { %v360_v59 = vpop.permute.xlu0 %359  }
  0xf1   :  { %v366_v60 = vpop.permute.xlu1 %365   ;;  %446 = vst.msk [vmem:[%s847_s1 + $0x3b] sm:$0x1] %vm8_vm0, %v360_v59  }
  0xf2   :  { %447 = vst.msk [vmem:[%s847_s1 + $0x3c] sm:$0x1] %vm8_vm0, %v366_v60  }
  0xf4   :  { %v372_v61 = vpop.permute.xlu0 %371  }
  0xf5   :  { %v378_v62 = vpop.permute.xlu1 %377   ;;  %448 = vst.msk [vmem:[%s847_s1 + $0x3d] sm:$0x1] %vm8_vm0, %v372_v61  }
  0xf6   :  { %449 = vst.msk [vmem:[%s847_s1 + $0x3e] sm:$0x1] %vm8_vm0, %v378_v62  }
  0xf8   :  { %v384_v63 = vpop.permute.xlu0 %383  }
  0xf9   :  { %450 = vst.msk [vmem:[%s847_s1 + $0x3f] sm:$0x1] %vm8_vm0, %v384_v63  }

// kernel: dsbw_forward.1
= control target key start
LH: loop header
LB: loop body
LE: loop exit
PB: predicated region body
PF: predicated region fallthrough
CT: control target
= control target key end

     0   :  { %s3349_s18 = smov 0   ;;  %s3351_s19 = smov 0   ;;  %s3755_s0 = inlined_call_operand.vmem [shape: bf16[2,64,64], index: 0, kind: input, shape index: {}]   ;;  %s3756_s1 = inlined_call_operand.vmem [shape: f32[2,32,1], index: 1, kind: input, shape index: {}]   ;;  %s3757_s2 = inlined_call_operand.vmem [shape: f32[2,32,1], index: 2, kind: input, shape index: {}]   ;;  %s3758_s3 = inlined_call_operand.vmem [shape: bf16[2,64,64], index: 3, kind: output, shape index: {0}]   ;;  %s3759_s4 = inlined_call_operand.vmem [shape: f32[2,32,1], index: 4, kind: output, shape index: {1}]   ;;  %s3760_s5 = inlined_call_operand.vmem [shape: f32[2,32,32], index: 5, kind: output, shape index: {2}]  }
   0x1   :  { %s3353_s20 = smov 0  }
   0x2 LB: > { %s3365_s21 = sadd.s32 4294967295, %s3314_s20   ;;  %s3368_s22 = sadd.s32 1, %s3314_s20   ;;  %s3314_s20 = sphi %s3353_s20, %s3770_s20   ;;  %s3310_s19 = sphi %s3351_s19, %s3769_s19   ;;  %s3306_s18 = sphi %s3349_s18, %s3768_s18  }
   0x3   : > { %s20_s23 = ssub.s32 %s3314_s20, %s3368_s22  ;;  %s23_s24 = sadd.s32 1, %s3310_s19 }
   0x4   : > { %p21_p0 = scmp.eq.s32.totalorder %s20_s23, 0  ;;  %p30_p1 = scmp.ne.s32.totalorder %s3310_s19, %s3306_s18 }
   0x5   : > { %p31_p2 = scmp.eq.s32.totalorder %s3314_s20, 0  ;;  %p112_p3 = scmp.eq.s32.totalorder %s3365_s21, 1 }
   0x6   : > { %s3378_s25 = scalar_select %p21_p0, %s3310_s19, %s23_s24  }
   0x7   : > { %p32_p4 = por %p31_p2, %p30_p1  ;;  %p3380_p5 = por %p112_p3, %p30_p1 }
   0x8   : > { %p2723_p6 = scmp.ge.s32.totalorder %s3314_s20, 2 }
   0xa   : > { %186 = sbr.rel (%p2723_p6) target bundleno = 21 (0x15), region = 16 }
   0xf   : > { %189 = sbr.rel (!%p32_p4) target bundleno = 21 (0x15), region = 20  ;;  %s191_s27 = sand.u32 (%p32_p4), 1, %s3310_s19  }
  0x10   : > { %s2851_s28 = sshll.u32 (%p32_p4), %s3314_s20, 4  ;;  %s2724_s29 = sshll.u32 (%p32_p4), %s191_s27, 5 }
  0x11   : > { %s196_s7 = scalar_lea.vmem (%p32_p4), %s3755_s0, %s2851_s28  ;;  %s193_s8 = scalar_lea.vmem (%p32_p4), [#allocation4], %s2724_s29 }
  0x12   : > { %v213_v0 = vld [vmem:[%s196_s7] sm:$0xff] (%p32_p4)   ;;  %v217_v1 = vld [vmem:[%s196_s7 + $0x8] sm:$0xff] (%p32_p4)  }
  0x13   : > { %v221_v2 = vld [vmem:[%s196_s7 + $0x20] sm:$0xff] (%p32_p4)   ;;  %214 = vst [vmem:[%s193_s8] sm:$0xff] (%p32_p4), %v213_v0   ;;  %218 = vst [vmem:[%s193_s8 + $0x8] sm:$0xff] (%p32_p4), %v217_v1   ;;  %v225_v3 = vld [vmem:[%s196_s7 + $0x28] sm:$0xff] (%p32_p4)  }
  0x14   : > { %222 = vst [vmem:[%s193_s8 + $0x10] sm:$0xff] %v221_v2   ;;  %226 = vst [vmem:[%s193_s8 + $0x18] sm:$0xff] %v225_v3  }
  0x15 PF: > { %p2727_p7 = scmp.ge.s32.totalorder %s3314_s20, 1  ;;  %p283_p8 = scmp.lt.s32.totalorder %s3314_s20, 3 }
  0x17   : > { %p284_p9 = pnand %p2727_p7, %p283_p8 }
  0x18   : > { %s290_s9 = sand.u32 (!%p284_p9), 1, %s3306_s18   ;;  %p337_p10 = scmp.lt.s32.totalorder (!%p284_p9), %s3365_s21, 1 }
  0x19   : > { %287 = sbr.rel (%p284_p9) target bundleno = 3434 (0xd6a), region = 69  ;;  %s3393_s10 = sshll.u32 (!%p284_p9), %s290_s9, 5 }
  0x1a   : > { %s3412_s11 = scalar_lea.vmem (!%p284_p9), [#allocation4], %s3393_s10  ;;  %s321_s6 = scalar_lea.vmem (!%p284_p9), [#allocation5], %s3393_s10 }
  0x1e   : > { %vm359_vm0 = vcmask 261120   ;;  %vm364_vm1 = vcmask 7168   ;;  %v3316_v4 = vmov 0.0   ;;  %v369_v5 = vld [vmem:[%s3412_s11] sm:$0xff]   ;;  %vm387_vm2 = vcmask 523264   ;;  %v371_v6 = vld [vmem:[%s3412_s11 + $0x8] sm:$0xff]  }
  0x1f   : > { %360 = vst.msk [vmem:[#allocation2] sm:$0xff] %vm359_vm0, %v3316_v4  ;;  %361 = vst.msk [vmem:[#allocation2 + $0x8] sm:$0xff] %vm359_vm0, %v3316_v4  ;;  %v455_v7 = vunpack.c.l.bf16 %v369_v5  ;;  %v456_v8 = vunpack.c.h.bf16 %v369_v5  ;;  %v457_v9 = vunpack.c.l.bf16 %v371_v6  ;;  %v2742_v10 = vld [vmem:[%s3412_s11 + $0x10] sm:$0xff]   ;;  %v458_v11 = vunpack.c.h.bf16 %v371_v6  ;;  %3005 = vmatprep.mubr.msk.bf16.mxu0 %vm387_vm2, %v369_v5  ;;  %v2744_v17 = vld [vmem:[%s3412_s11 + $0x18] sm:$0xff]   ;;  %3243 = vmatprep.subr.msk.bf16.mxu0 %vm387_vm2, %v371_v6  ;;  %s338_s12 = scalar_select %p337_p10, %s3365_s21, 1 }
  0x20   : > { %362 = vst.msk [vmem:[#allocation2 + $0x10] sm:$0xff] %vm359_vm0, %v3316_v4  ;;  %363 = vst.msk [vmem:[#allocation2 + $0x18] sm:$0xff] %vm359_vm0, %v3316_v4  ;;  %v597_v14 = vlaneseq  ;;  %v565_v15 = vunpack.c.l.bf16 %v2742_v10  ;;  %v566_v16 = vunpack.c.h.bf16 %v2742_v10  ;;  %3013 = vmatprep.mubr.msk.bf16.mxu1 %vm387_vm2, %v2742_v10  ;;  %v392_v20 = vsel %vm387_vm2, %v371_v6, 0  ;;  %3245 = vmatprep.subr.msk.bf16.mxu1 %vm387_vm2, %v2744_v17  ;;  %s2864_s7 = sshll.u32 (%p3380_p5), %s3365_s21, 4 }
  0x21   : > { %365 = vst.msk [vmem:[#allocation3] sm:$0xff] %vm364_vm1, %v3316_v4  ;;  %366 = vst.msk [vmem:[#allocation3 + $0x8] sm:$0xff] %vm364_vm1, %v3316_v4  ;;  %v459_v12 = vsel %vm387_vm2, %v455_v7, 0.0  ;;  %v465_v13 = vsel %vm387_vm2, %v457_v9, 0.0  ;;  %v462_v18 = vsel %vm387_vm2, %v456_v8, 0.0  ;;  %v468_v19 = vsel %vm387_vm2, %v458_v11, 0.0  ;;  %3002 = vmatpush3.bf16.xpose.msra.mxu0 %v392_v20  ;;  %s2514_s10 = scalar_lea.vmem (%p3380_p5), %s3758_s3, %s2864_s7 }
  0x22   : > { %367 = vst.msk [vmem:[#allocation3 + $0x10] sm:$0xff] %vm364_vm1, %v3316_v4  ;;  %368 = vst.msk [vmem:[#allocation3 + $0x18] sm:$0xff] %vm364_vm1, %v3316_v4  ;;  %460 = vadd.xlane.f32.xlu0 %v459_v12  ;;  %466 = vadd.xlane.f32.xlu1 %v465_v13  ;;  %v502_v21 = vsel %vm387_vm2, %v2744_v17, 0  ;;  %v598_v22 = vshrl.u32 %v597_v14, 7  ;;  %v569_v23 = vsel %vm387_vm2, %v565_v15, 0.0  ;;  %v572_v24 = vsel %vm387_vm2, %v566_v16, 0.0 }
  0x23   : > { %v567_v25 = vunpack.c.l.bf16 %v2744_v17  ;;  %v568_v26 = vunpack.c.h.bf16 %v2744_v17  ;;  %3010 = vmatpush3.bf16.xpose.msra.mxu1 %v502_v21  ;;  %3244 = vmatprep.subr.msk.bf16.mxu0 %vm387_vm2, %v369_v5  ;;  %v603_v28 = vand.u32 127, %v597_v14  ;;  %v389_v31 = vsel %vm387_vm2, %v369_v5, 0  ;;  %s3510_s13 = sshll.u32 %s338_s12, 5 }
  0x24   : > { %3246 = vmatprep.subr.msk.bf16.mxu1 %vm387_vm2, %v2742_v10  ;;  %v601_v27 = vadd.s32 24, %v598_v22  ;;  %v499_v32 = vsel %vm387_vm2, %v2742_v10, 0  ;;  %v3317_v34 = vmov 1.0   ;;  %v600_v35 = vadd.s32 16, %v598_v22  ;;  %s352_s16 = scalar_lea.vmem %s3759_s4, %s3510_s13  ;;  %s341_s20 = scalar_lea.vmem %s3756_s1, %s3510_s13 }
  0x25   : > { %v575_v29 = vsel %vm387_vm2, %v567_v25, 0.0  ;;  %v578_v30 = vsel %vm387_vm2, %v568_v26, 0.0  ;;  %vm3444_vm4 = vcmp.eq.s32.totalorder %v598_v22, %v603_v28  ;;  %v599_v37 = vadd.s32 8, %v598_v22  ;;  %s357_s27 = scalar_lea.vmem %s3760_s5, %s3510_s13  ;;  %s346_s30 = scalar_lea.vmem %s3757_s2, %s3510_s13 }
  0x26   : > { %463 = vadd.xlane.f32.xlu0 %v462_v18  ;;  %469 = vadd.xlane.f32.xlu1 %v468_v19  ;;  %vm3436_vm3 = vcmp.eq.s32.totalorder %v601_v27, %v603_v28  ;;  %v3451_v38 = vsel %vm3444_vm4, 1.0, %v3316_v4  ;;  %vm3453_vm5 = vcmp.eq.s32.totalorder %v600_v35, %v603_v28  ;;  %v3318_v42 = vmov 0   ;;  %v373_v14 = vld [vmem:[#allocation2] sm:$0xff]  ;;  %v374_v21 = vld [vmem:[#allocation2 + $0x8] sm:$0xff] }
  0x27   : > { %vm605_vm6 = vcmp.eq.s32.totalorder %v599_v37, %v603_v28  ;;  %v3481_v41 = vsel %vm3453_vm5, 1.0, %v3316_v4  ;;  %3274 = vset.pattern.permute.xlu0 %v3318_v42  ;;  %3275 = vset.pattern.permute.xlu1 %v3318_v42  ;;  %v3492_v43 = vsel %vm3436_vm3, 1.0, %v3316_v4  ;;  %v375_v12 = vld [vmem:[#allocation2 + $0x10] sm:$0xff]  ;;  %vm2396_vm9 = vcmask 519168  }
  0x28   : > { %v3474_v40 = vsel %vm605_vm6, 1.0, %v3316_v4  ;;  %v451_v44 = vld [vmem:[#allocation3] sm:$0xff]  ;;  %v452_v50 = vld [vmem:[#allocation3 + $0x8] sm:$0xff] }
  0x29   : > { %3004 = vmatpush3.bf16.xpose.msra.mxu0 %v389_v31  ;;  %v453_v45 = vld [vmem:[#allocation3 + $0x10] sm:$0xff]  ;;  %v454_v51 = vld [vmem:[#allocation3 + $0x18] sm:$0xff] }
  0x2a   : > { %570 = vadd.xlane.f32.xlu0 %v569_v23  ;;  %573 = vadd.xlane.f32.xlu1 %v572_v24 }
  0x2b   : > { %3012 = vmatpush3.bf16.xpose.msra.mxu1 %v499_v32  ;;  %3017 = vmatprep.subr.msk.mxu0 %vm3436_vm3, %v3317_v34 }
  0x2c   : > { %3031 = vmatprep.subr.msk.mxu1 %vm3436_vm3, %v3317_v34 }
  0x2e   : > { %576 = vadd.xlane.f32.xlu0 %v575_v29  ;;  %579 = vadd.xlane.f32.xlu1 %v578_v30 }
  0x30   : > { %3006 = vmatmul.mubr.msk.bf16.vlgmr.msra.gmra.mxu0 %vm387_vm2, %v371_v6 }
  0x31   : > { %3018 = vmatpush3.msk.msra.mxu0 %vm3436_vm3, %v3317_v34  ;;  %3025 = vmatprep.mubr.msk.f32.mxu0 %vm359_vm0, %v3451_v38 }
  0x32   : > { %3014 = vmatmul.mubr.msk.bf16.vlgmr.msra.gmra.mxu1 %vm387_vm2, %v2744_v17  ;;  %3019 = vmatprep.subr.msk.mxu0 %vm3453_vm5, %v3317_v34  ;;  %v376_v17 = vld [vmem:[#allocation2 + $0x18] sm:$0xff] }
  0x33   : > { %3032 = vmatpush3.msk.msra.mxu1 %vm3436_vm3, %v3317_v34  ;;  %3020 = vmatpush3.msk.msra.mxu0 %vm3453_vm5, %v3317_v34 }
  0x34   : > { %3033 = vmatprep.subr.msk.mxu1 %vm3453_vm5, %v3317_v34  ;;  %3021 = vmatprep.subr.msk.mxu0 %vm605_vm6, %v3317_v34 }
  0x35   : > { %3034 = vmatpush3.msk.msra.mxu1 %vm3453_vm5, %v3317_v34  ;;  %3022 = vmatpush3.msk.msra.mxu0 %vm605_vm6, %v3317_v34 }
  0x36   : > { %3035 = vmatprep.subr.msk.mxu1 %vm605_vm6, %v3317_v34  ;;  %3023 = vmatprep.subr.msk.mxu0 %vm3444_vm4, %v3317_v34 }
  0x37   : > { %3036 = vmatpush3.msk.msra.mxu1 %vm605_vm6, %v3317_v34  ;;  %3024 = vmatpush3.msk.msra.mxu0 %vm3444_vm4, %v3317_v34 }
  0x38   : > { %3026 = vmatmul.mubr.msk.f32.vlgmr.msra.gmra.mxu0 %vm359_vm0, %v3474_v40  ;;  %3037 = vmatprep.subr.msk.mxu1 %vm3444_vm4, %v3317_v34 }
  0x39   : > { %3028 = vmatprep.mubr.msk.f32.mxu0 %vm359_vm0, %v3481_v41  ;;  %3038 = vmatpush3.msk.msra.mxu1 %vm3444_vm4, %v3317_v34 }
  0x3c   : > { %3029 = vmatmul.mubr.msk.f32.gmra.mxu0 %vm359_vm0, %v3492_v43 }
  0xab   : > { %v461_v46 = vpop.xlane.xlu0 %460  ;;  %v467_v47 = vpop.xlane.xlu1 %466 }
  0xac   : > { %v471_v48 = vadd.f32 %v461_v46, %v451_v44  ;;  %v473_v49 = vadd.f32 %v467_v47, %v453_v45 }
  0xae   : > { %475 = vst.msk [vmem:[#allocation3] sm:$0xff] %vm364_vm1, %v471_v48  ;;  %477 = vst.msk [vmem:[#allocation3 + $0x10] sm:$0xff] %vm364_vm1, %v473_v49 }
  0xaf   : > { %v464_v52 = vpop.xlane.xlu0 %463  ;;  %v470_v53 = vpop.xlane.xlu1 %469 }
  0xb0   : > { %v472_v54 = vadd.f32 %v464_v52, %v452_v50  ;;  %v474_v55 = vadd.f32 %v470_v53, %v454_v51 }
  0xb2   : > { %476 = vst.msk [vmem:[#allocation3 + $0x8] sm:$0xff] %vm364_vm1, %v472_v54  ;;  %478 = vst.msk [vmem:[#allocation3 + $0x18] sm:$0xff] %vm364_vm1, %v474_v55 }
  0xb3   : > { %v571_v56 = vpop.xlane.xlu0 %570  ;;  %v574_v57 = vpop.xlane.xlu1 %573 }
  0xb5   : > { %v561_v58 = vld [vmem:[#allocation3] sm:$0xff]  ;;  %v563_v59 = vld [vmem:[#allocation3 + $0x10] sm:$0xff] }
  0xb6   : > { %v581_v60 = vadd.f32 %v571_v56, %v561_v58 }
  0xb7   : > { %v577_v61 = vpop.xlane.xlu0 %576  ;;  %v580_v62 = vpop.xlane.xlu1 %579 }
  0xb8   : > { %585 = vst.msk [vmem:[#allocation3] sm:$0xff] %vm364_vm1, %v581_v60  ;;  %v583_v63 = vadd.f32 %v577_v61, %v563_v59 }
  0xb9   : > { %v562_v0 = vld [vmem:[#allocation3 + $0x8] sm:$0xff]  ;;  %v564_v1 = vld [vmem:[#allocation3 + $0x18] sm:$0xff] }
  0xba   : > { %v582_v2 = vadd.f32 %v574_v57, %v562_v0  ;;  %587 = vst.msk [vmem:[#allocation3 + $0x10] sm:$0xff] %vm364_vm1, %v583_v63  ;;  %v584_v3 = vadd.f32 %v580_v62, %v564_v1 }
  0xbc   : > { %586 = vst.msk [vmem:[#allocation3 + $0x8] sm:$0xff] %vm364_vm1, %v582_v2  ;;  %588 = vst.msk [vmem:[#allocation3 + $0x18] sm:$0xff] %vm364_vm1, %v584_v3 }
  0xbf   : > { %v589_v4 = vld [vmem:[#allocation3] sm:$0xff] }
  0xc0   : > { %v593_v5 = vmul.f32 0.0078125, %v589_v4  ;;  %v669_v4 = vmul.f32 1e-05, %v3451_v38 }
  0xc1   : > { %v591_v6 = vld [vmem:[#allocation3 + $0x10] sm:$0xff] }
  0xc2   : > { %618 = vperm.xlu0 %3274, %v593_v5   ;;  %2487 = vst.msk [vmem:[%s352_s16] sm:$0xff] %vm364_vm1, %v593_v5  ;;  %v595_v7 = vmul.f32 0.0078125, %v591_v6  ;;  %v670_v5 = vmul.f32 1e-05, %v3474_v40 }
  0xc3   : > { %v590_v8 = vld [vmem:[#allocation3 + $0x8] sm:$0xff]  ;;  %v592_v9 = vld [vmem:[#allocation3 + $0x18] sm:$0xff] }
  0xc4   : > { %v594_v10 = vmul.f32 0.0078125, %v590_v8  ;;  %2489 = vst.msk [vmem:[%s352_s16 + $0x10] sm:$0xff] %vm364_vm1, %v595_v7  ;;  %v596_v11 = vmul.f32 0.0078125, %v592_v9  ;;  %v671_v9 = vmul.f32 1e-05, %v3481_v41 }
  0xc6   : > { %623 = vperm.xlu1 %3275, %v594_v10   ;;  %2488 = vst.msk [vmem:[%s352_s16 + $0x8] sm:$0xff] %vm364_vm1, %v594_v10  ;;  %2490 = vst.msk [vmem:[%s352_s16 + $0x18] sm:$0xff] %vm364_vm1, %v596_v11 }
  0xca   : > { %628 = vperm.xlu1 %3275, %v595_v7  }
  0xce   : > { %633 = vperm.xlu1 %3275, %v596_v11  }
  0xf0   : > { %v3007_v13 = vpop.f32.mrf.mxu0 }
  0xf1   : > { %v445_v15 = vadd.f32 %v3007_v13, %v375_v12 }
  0xf2   : > { %v428_v16 = vpop.f32.mrf.mxu0  ;;  %v3015_v18 = vpop.f32.mrf.mxu1 }
  0xf3   : > { %449 = vst.msk [vmem:[#allocation2 + $0x10] sm:$0xff] %vm359_vm0, %v445_v15  ;;  %v443_v19 = vadd.f32 %v428_v16, %v373_v14 }
  0xf4   : > { %v3008_v20 = vpop.f32.mrf.mxu0  ;;  %v538_v24 = vpop.f32.mrf.mxu1 }
  0xf5   : > { %447 = vst.msk [vmem:[#allocation2] sm:$0xff] %vm359_vm0, %v443_v19  ;;  %v446_v22 = vadd.f32 %v3008_v20, %v376_v17  ;;  %v672_v19 = vmul.f32 1e-05, %v3492_v43 }
  0xf6   : > { %v431_v23 = vpop.f32.mrf.mxu0  ;;  %v3016_v28 = vpop.f32.mrf.mxu1 }
  0xf7   : > { %450 = vst.msk [vmem:[#allocation2 + $0x18] sm:$0xff] %vm359_vm0, %v446_v22  ;;  %v444_v25 = vadd.f32 %v431_v23, %v374_v21 }
  0xf8   : > { %v3027_v26 = vpop.f32.mrf.mxu0  ;;  %v541_v35 = vpop.f32.mrf.mxu1 }
  0xf9   : > { %448 = vst.msk [vmem:[#allocation2 + $0x8] sm:$0xff] %vm359_vm0, %v444_v25 }
  0xfa   : > { %v486_v27 = vld [vmem:[#allocation2 + $0x10] sm:$0xff]  ;;  %v787_v29 = vpop.f32.mrf.mxu0 }
  0xfb   : > { %v555_v30 = vadd.f32 %v3015_v18, %v486_v27  ;;  %3039 = vmatprep.mubr.msk.f32.mxu1 %vm359_vm0, %v787_v29 }
  0xfc   : > { %v484_v31 = vld [vmem:[#allocation2] sm:$0xff]  ;;  %v3030_v32 = vpop.f32.mrf.mxu0  ;;  %3040 = vmatmul.mubr.msk.f32.vlgmr.msra.gmra.mxu1 %vm359_vm0, %v3027_v26 }
  0xfd   : > { %559 = vst.msk [vmem:[#allocation2 + $0x10] sm:$0xff] %vm359_vm0, %v555_v30  ;;  %v553_v33 = vadd.f32 %v538_v24, %v484_v31 }
  0xfe   : > { %v487_v34 = vld [vmem:[#allocation2 + $0x18] sm:$0xff]  ;;  %v797_v36 = vpop.f32.mrf.mxu0 }
  0xff   : > { %557 = vst.msk [vmem:[#allocation2] sm:$0xff] %vm359_vm0, %v553_v33  ;;  %v556_v37 = vadd.f32 %v3016_v28, %v487_v34  ;;  %3042 = vmatprep.mubr.msk.f32.mxu1 %vm359_vm0, %v797_v36  ;;  %v2236_v33 = vld [vmem:[%s341_s20 + $0x8] sm:$0xff]  ;;  %v2235_v34 = vld [vmem:[%s341_s20] sm:$0xff]  ;;  %v2238_v36 = vld [vmem:[%s341_s20 + $0x18] sm:$0xff] }
 0x100   : > { %v485_v39 = vld [vmem:[#allocation2 + $0x8] sm:$0xff]  ;;  %3043 = vmatmul.mubr.msk.f32.gmra.mxu1 %vm359_vm0, %v3030_v32 }
 0x101   : > { %560 = vst.msk [vmem:[#allocation2 + $0x18] sm:$0xff] %vm359_vm0, %v556_v37  ;;  %v554_v42 = vadd.f32 %v541_v35, %v485_v39  ;;  %v2237_v35 = vld [vmem:[%s341_s20 + $0x10] sm:$0xff] }
 0x103   : > { %558 = vst.msk [vmem:[#allocation2 + $0x8] sm:$0xff] %vm359_vm0, %v554_v42 }
 0x104   : > { %v655_v2 = vld [vmem:[#allocation2 + $0x10] sm:$0xff] }
 0x105   : > { %v659_v8 = vmul.f32 0.0078125, %v655_v2 }
 0x106   : > { %v653_v0 = vld [vmem:[#allocation2] sm:$0xff] }
 0x107   : > { %v657_v6 = vmul.f32 0.0078125, %v653_v0 }
 0x108   : > { %v656_v10 = vld [vmem:[#allocation2 + $0x18] sm:$0xff] }
 0x109   : > { %v660_v18 = vmul.f32 0.0078125, %v656_v10 }
 0x10a   : > { %v654_v1 = vld [vmem:[#allocation2 + $0x8] sm:$0xff] }
 0x10b   : > { %v658_v7 = vmul.f32 0.0078125, %v654_v1  ;;  %v903_v1 = vmul.f32 1.5, %v3451_v38 }
 0x13d   : > { %v619_v44 = vpop.permute.xlu0 %618 }
 0x13e   : > { %v636_v47 = vmul.f32 %v3451_v38, %v619_v44 }
 0x140   : > { %v640_v51 = vsel %vm359_vm0, %v636_v47, 0.0 }
 0x141   : > { %v624_v45 = vpop.permute.xlu1 %623 }
 0x142   : > { %v637_v46 = vmul.f32 %v3474_v40, %v624_v45 }
 0x144   : > { %v641_v49 = vsel %vm359_vm0, %v637_v46, 0.0 }
 0x145   : > { %v629_v48 = vpop.permute.xlu1 %628  ;;  %v642_v53 = vadd.f32 %v641_v49, %v640_v51 }
 0x146   : > { %v638_v50 = vmul.f32 %v3481_v41, %v629_v48 }
 0x148   : > { %v643_v52 = vsel %vm359_vm0, %v638_v50, 0.0 }
 0x149   : > { %v634_v54 = vpop.permute.xlu1 %633  ;;  %v644_v56 = vadd.f32 %v643_v52, %v642_v53 }
 0x14a   : > { %v639_v55 = vmul.f32 %v3492_v43, %v634_v54 }
 0x14c   : > { %v645_v57 = vsel %vm359_vm0, %v639_v55, 0.0 }
 0x14d   : > { %v646_v58 = vadd.f32 %v645_v57, %v644_v56 }
 0x14f   : > { %v647_v59 = vrot.slane %v646_v58, 4 }
 0x151   : > { %v648_v60 = vadd.f32 %v647_v59, %v646_v58 }
 0x153   : > { %v649_v61 = vrot.slane %v648_v60, 2 }
 0x155   : > { %v650_v62 = vadd.f32 %v649_v61, %v648_v60 }
 0x157   : > { %v651_v63 = vrot.slane %v650_v62, 1 }
 0x159   : > { %v3540_v3 = vadd.f32 %v651_v63, %v650_v62 }
 0x15b   : > { %v664_v11 = vmul.f32 %v3540_v3, %v634_v54  ;;  %v661_v12 = vmul.f32 %v3540_v3, %v619_v44  ;;  %v662_v13 = vmul.f32 %v3540_v3, %v624_v45  ;;  %v663_v14 = vmul.f32 %v3540_v3, %v629_v48 }
 0x15d   : > { %v665_v15 = vsub.f32 %v657_v6, %v661_v12  ;;  %v666_v16 = vsub.f32 %v658_v7, %v662_v13  ;;  %v667_v17 = vsub.f32 %v659_v8, %v663_v14  ;;  %v668_v23 = vsub.f32 %v660_v18, %v664_v11 }
 0x15e   : > { %v904_v11 = vmul.f32 1.5, %v3474_v40 }
 0x15f   : > { %v673_v20 = vadd.f32 %v669_v4, %v665_v15  ;;  %v674_v21 = vadd.f32 %v670_v5, %v666_v16  ;;  %v675_v22 = vadd.f32 %v671_v9, %v667_v17  ;;  %v676_v29 = vadd.f32 %v672_v19, %v668_v23 }
 0x160   : > { %v906_v5 = vmul.f32 1.5, %v3492_v43  ;;  %v905_v9 = vmul.f32 1.5, %v3481_v41 }
 0x161   : > { %v677_v24 = vmul.f32 %v3451_v38, %v673_v20  ;;  %v678_v25 = vmul.f32 %v3474_v40, %v674_v21  ;;  %v679_v28 = vmul.f32 %v3481_v41, %v675_v22  ;;  %v680_v31 = vmul.f32 %v3492_v43, %v676_v29 }
 0x163   : > { %v681_v26 = vsel %vm359_vm0, %v677_v24, 0.0  ;;  %v684_v27 = vsel %vm359_vm0, %v678_v25, 0.0  ;;  %v687_v30 = vsel %vm359_vm0, %v679_v28, 0.0  ;;  %v690_v32 = vsel %vm359_vm0, %v680_v31, 0.0 }
 0x164   : > { %682 = vadd.xlane.f32.xlu1 %v681_v26  ;;  %685 = vadd.xlane.f32.xlu0 %v684_v27 }
 0x168   : > { %688 = vadd.xlane.f32.xlu1 %v687_v30 }
 0x16c   : > { %691 = vadd.xlane.f32.xlu1 %v690_v32 }
 0x17a   : > { %2246 = vperm.xlu0 %3274, %v2236_v33  }
 0x17d   : > { %2241 = vperm.xlu1 %3275, %v2235_v34  }
 0x181   : > { %2251 = vperm.xlu1 %3275, %v2237_v35  }
 0x185   : > { %2256 = vperm.xlu1 %3275, %v2238_v36  }
 0x1bc   : > { %v3041_v37 = vpop.f32.mrf.mxu1 }
 0x1be   : > { %v884_v39 = vpop.f32.mrf.mxu1 }
 0x1bf   : > { %3053 = vmatprep.mubr.msk.f32.mxu0 %vm359_vm0, %v884_v39 }
 0x1c0   : > { %v3044_v61 = vpop.f32.mrf.mxu1 }
 0x1c2   : > { %v894_v63 = vpop.f32.mrf.mxu1 }
 0x1ed   : > { %v683_v42 = vpop.xlane.xlu1 %682  ;;  %v686_v44 = vpop.xlane.xlu0 %685 }
 0x1ee   : > { %v693_v46 = vadd.f32 %v686_v44, %v683_v42 }
 0x1f1   : > { %v689_v45 = vpop.xlane.xlu1 %688 }
 0x1f2   : > { %v694_v47 = vadd.f32 %v693_v46, %v689_v45 }
 0x1f5   : > { %v692_v48 = vpop.xlane.xlu1 %691 }
 0x1f6   : > { %v695_v49 = vadd.f32 %v694_v47, %v692_v48 }
 0x1f8   : > { %v696_v50 = vrot.slane %v695_v49, 4 }
 0x1fa   : > { %v697_v51 = vadd.f32 %v696_v50, %v695_v49 }
 0x1fc   : > { %v698_v52 = vrot.slane %v697_v51, 2 }
 0x1fe   : > { %v699_v53 = vadd.f32 %v698_v52, %v697_v51 }
 0x200   : > { %v700_v54 = vrot.slane %v699_v53, 1 }
 0x202   : > { %v701_v55 = vadd.f32 %v700_v54, %v699_v53 }
 0x204   : > { %v702_v56 = vmax.f32 %v701_v55, 1e-05 }
 0x206   : > { %3288 = vrcp.f32 %v702_v56 }
 0x213   : > { %v3563_v57 = vpop.eup %3288 }
 0x214   : > { %v3566_v58 = vmul.f32 %v3563_v57, %v676_v29  ;;  %v3570_v59 = vmul.f32 %v3563_v57, %v675_v22  ;;  %v3575_v60 = vmul.f32 %v3563_v57, %v674_v21  ;;  %v3580_v62 = vmul.f32 %v3563_v57, %v673_v20 }
 0x215   : > { %3290 = vrsqrt.f32 %v3563_v57  ;;  %vm2226_vm7 = vcmp.eq.f32.partialorder %v3563_v57, inf  ;;  %vm2228_vm8 = vcmp.eq.f32.partialorder %v3563_v57, 0.0 }
 0x216   : > { %3045 = vmatprep.subr.mxu0 %v3566_v58 }
 0x217   : > { %3046 = vmatpush3.msra.mxu0 %v3566_v58 }
 0x218   : > { %3047 = vmatprep.subr.mxu0 %v3570_v59 }
 0x219   : > { %3048 = vmatpush3.msra.mxu0 %v3570_v59 }
 0x21a   : > { %3049 = vmatprep.subr.mxu0 %v3575_v60 }
 0x21b   : > { %3050 = vmatpush3.msra.mxu0 %v3575_v60 }
 0x21c   : > { %3051 = vmatprep.subr.mxu0 %v3580_v62 }
 0x21d   : > { %3052 = vmatpush3.msra.mxu0 %v3580_v62 }
 0x21e   : > { %3054 = vmatmul.mubr.msk.f32.vlgmr.msra.gmra.mxu0 %vm359_vm0, %v3041_v37 }
 0x21f   : > { %3056 = vmatprep.mubr.msk.f32.mxu0 %vm359_vm0, %v894_v63 }
 0x222   : > { %3057 = vmatmul.mubr.msk.f32.gmra.mxu0 %vm359_vm0, %v3044_v61 }
 0x2de   : > { %v3055_v0 = vpop.f32.mrf.mxu0 }
 0x2df   : > { %v1005_v12 = vmul.f32 0.5, %v3055_v0 }
 0x2e0   : > { %v985_v2 = vpop.f32.mrf.mxu0 }
 0x2e1   : > { %v1004_v4 = vmul.f32 0.5, %v985_v2  ;;  %v1009_v38 = vsub.f32 %v904_v11, %v1005_v12 }
 0x2e2   : > { %v3058_v6 = vpop.f32.mrf.mxu0 }
 0x2e3   : > { %v1008_v7 = vsub.f32 %v903_v1, %v1004_v4  ;;  %v1007_v8 = vmul.f32 0.5, %v3058_v6  ;;  %v1207_v34 = vmul.f32 1.5, %v1009_v38 }
 0x2e4   : > { %v995_v10 = vpop.f32.mrf.mxu0 }
 0x2e5   : > { %v1011_v13 = vsub.f32 %v906_v5, %v1007_v8  ;;  %v1006_v14 = vmul.f32 0.5, %v995_v10  ;;  %3067 = vmatprep.mubr.msk.f32.mxu1 %vm359_vm0, %v1008_v7  ;;  %v1206_v23 = vmul.f32 1.5, %v1008_v7 }
 0x2e7   : > { %v1010_v15 = vsub.f32 %v905_v9, %v1006_v14  ;;  %3059 = vmatprep.subr.mxu1 %v1011_v13  ;;  %3073 = vmatprep.subr.mxu0 %v1011_v13  ;;  %v1209_v27 = vmul.f32 1.5, %v1011_v13 }
 0x2e8   : > { %3060 = vmatpush3.msra.mxu1 %v1011_v13  ;;  %3074 = vmatpush3.msra.mxu0 %v1011_v13 }
 0x2e9   : > { %3061 = vmatprep.subr.mxu1 %v1010_v15  ;;  %3075 = vmatprep.subr.mxu0 %v1010_v15  ;;  %v1208_v32 = vmul.f32 1.5, %v1010_v15 }
 0x2ea   : > { %3062 = vmatpush3.msra.mxu1 %v1010_v15  ;;  %3076 = vmatpush3.msra.mxu0 %v1010_v15 }
 0x2eb   : > { %3063 = vmatprep.subr.mxu1 %v1009_v38  ;;  %3077 = vmatprep.subr.mxu0 %v1009_v38 }
 0x2ec   : > { %3064 = vmatpush3.msra.mxu1 %v1009_v38  ;;  %3078 = vmatpush3.msra.mxu0 %v1009_v38 }
 0x2ed   : > { %3065 = vmatprep.subr.mxu1 %v1008_v7  ;;  %3079 = vmatprep.subr.mxu0 %v1008_v7 }
 0x2ee   : > { %3066 = vmatpush3.msra.mxu1 %v1008_v7  ;;  %3080 = vmatpush3.msra.mxu0 %v1008_v7 }
 0x2ef   : > { %3068 = vmatmul.mubr.msk.f32.vlgmr.msra.gmra.mxu1 %vm359_vm0, %v1009_v38  ;;  %3087 = vmatprep.subr.mxu1 %v3566_v58 }
 0x2f0   : > { %3070 = vmatprep.mubr.msk.f32.mxu1 %vm359_vm0, %v1010_v15  ;;  %3088 = vmatpush3.msra.mxu1 %v3566_v58 }
 0x2f1   : > { %3089 = vmatprep.subr.mxu1 %v3570_v59 }
 0x2f2   : > { %3090 = vmatpush3.msra.mxu1 %v3570_v59 }
 0x2f3   : > { %3071 = vmatmul.mubr.msk.f32.gmra.mxu1 %vm359_vm0, %v1011_v13  ;;  %3091 = vmatprep.subr.mxu1 %v3575_v60 }
 0x2f4   : > { %3092 = vmatpush3.msra.mxu1 %v3575_v60 }
 0x2f5   : > { %3093 = vmatprep.subr.mxu1 %v3580_v62 }
 0x2f6   : > { %3094 = vmatpush3.msra.mxu1 %v3580_v62 }
 0x3af   : > { %v3069_v40 = vpop.f32.mrf.mxu1 }
 0x3b1   : > { %v1090_v41 = vpop.f32.mrf.mxu1 }
 0x3b2   : > { %3081 = vmatprep.mubr.msk.f32.mxu0 %vm359_vm0, %v1090_v41 }
 0x3b3   : > { %v3072_v43 = vpop.f32.mrf.mxu1  ;;  %3082 = vmatmul.mubr.msk.f32.vlgmr.msra.gmra.mxu0 %vm359_vm0, %v3069_v40 }
 0x3b5   : > { %v1100_v16 = vpop.f32.mrf.mxu1 }
 0x3b6   : > { %3084 = vmatprep.mubr.msk.f32.mxu0 %vm359_vm0, %v1100_v16 }
 0x3b7   : > { %3085 = vmatmul.mubr.msk.f32.gmra.mxu0 %vm359_vm0, %v3072_v43 }
 0x473   : > { %v3083_v17 = vpop.f32.mrf.mxu0 }
 0x475   : > { %v1187_v18 = vpop.f32.mrf.mxu0 }
 0x476   : > { %3095 = vmatprep.mubr.msk.f32.mxu1 %vm359_vm0, %v1187_v18 }
 0x477   : > { %v3086_v19 = vpop.f32.mrf.mxu0  ;;  %3096 = vmatmul.mubr.msk.f32.vlgmr.msra.gmra.mxu1 %vm359_vm0, %v3083_v17 }
 0x479   : > { %v1197_v20 = vpop.f32.mrf.mxu0 }
 0x47a   : > { %3098 = vmatprep.mubr.msk.f32.mxu1 %vm359_vm0, %v1197_v20 }
 0x47b   : > { %3099 = vmatmul.mubr.msk.f32.gmra.mxu1 %vm359_vm0, %v3086_v19 }
 0x537   : > { %v3097_v21 = vpop.f32.mrf.mxu1 }
 0x538   : > { %v1308_v30 = vmul.f32 0.5, %v3097_v21 }
 0x539   : > { %v1288_v22 = vpop.f32.mrf.mxu1 }
 0x53a   : > { %v1307_v24 = vmul.f32 0.5, %v1288_v22  ;;  %v1312_v36 = vsub.f32 %v1207_v34, %v1308_v30  ;;  %v3283_v34 = vld [vmem:[%s3412_s11 + $0x10] sm:$0xff]  }
 0x53b   : > { %v3100_v25 = vpop.f32.mrf.mxu1 }
 0x53c   : > { %v1311_v26 = vsub.f32 %v1206_v23, %v1307_v24  ;;  %v1310_v28 = vmul.f32 0.5, %v3100_v25  ;;  %v1510_v4 = vmul.f32 1.5, %v1312_v36 }
 0x53d   : > { %v1298_v29 = vpop.f32.mrf.mxu1 }
 0x53e   : > { %v1314_v31 = vsub.f32 %v1209_v27, %v1310_v28  ;;  %v1309_v33 = vmul.f32 0.5, %v1298_v29  ;;  %3109 = vmatprep.mubr.msk.f32.mxu0 %vm359_vm0, %v1311_v26  ;;  %v1509_v51 = vmul.f32 1.5, %v1311_v26 }
 0x540   : > { %v1313_v35 = vsub.f32 %v1208_v32, %v1309_v33  ;;  %3101 = vmatprep.subr.mxu0 %v1314_v31  ;;  %3115 = vmatprep.subr.mxu1 %v1314_v31  ;;  %v1512_v55 = vmul.f32 1.5, %v1314_v31  ;;  %v3281_v32 = vld [vmem:[%s3412_s11 + $0x18] sm:$0xff]   ;;  %v3282_v33 = vld [vmem:[%s3412_s11] sm:$0xff]  }
 0x541   : > { %3102 = vmatpush3.msra.mxu0 %v1314_v31  ;;  %3116 = vmatpush3.msra.mxu1 %v1314_v31 }
 0x542   : > { %3103 = vmatprep.subr.mxu0 %v1313_v35  ;;  %3117 = vmatprep.subr.mxu1 %v1313_v35  ;;  %v1511_v1 = vmul.f32 1.5, %v1313_v35 }
 0x543   : > { %3104 = vmatpush3.msra.mxu0 %v1313_v35  ;;  %3118 = vmatpush3.msra.mxu1 %v1313_v35 }
 0x544   : > { %3105 = vmatprep.subr.mxu0 %v1312_v36  ;;  %3119 = vmatprep.subr.mxu1 %v1312_v36 }
 0x545   : > { %3106 = vmatpush3.msra.mxu0 %v1312_v36  ;;  %3120 = vmatpush3.msra.mxu1 %v1312_v36 }
 0x546   : > { %3107 = vmatprep.subr.mxu0 %v1311_v26  ;;  %3121 = vmatprep.subr.mxu1 %v1311_v26 }
 0x547   : > { %3108 = vmatpush3.msra.mxu0 %v1311_v26  ;;  %3122 = vmatpush3.msra.mxu1 %v1311_v26 }
 0x548   : > { %3110 = vmatmul.mubr.msk.f32.vlgmr.msra.gmra.mxu0 %vm359_vm0, %v1312_v36  ;;  %3129 = vmatprep.subr.mxu0 %v3566_v58 }
 0x549   : > { %3112 = vmatprep.mubr.msk.f32.mxu0 %vm359_vm0, %v1313_v35  ;;  %3130 = vmatpush3.msra.mxu0 %v3566_v58  ;;  %v3291_v35 = vpop.eup %3290 }
 0x54a   : > { %3131 = vmatprep.subr.mxu0 %v3570_v59  ;;  %v2225_v36 = vmul.f32 %v3291_v35, %v3563_v57 }
 0x54b   : > { %3132 = vmatpush3.msra.mxu0 %v3570_v59 }
 0x54c   : > { %3113 = vmatmul.mubr.msk.f32.gmra.mxu0 %vm359_vm0, %v1314_v31  ;;  %3133 = vmatprep.subr.mxu0 %v3575_v60  ;;  %v3280_v31 = vld [vmem:[%s3412_s11 + $0x8] sm:$0xff]  }
 0x54d   : > { %3134 = vmatpush3.msra.mxu0 %v3575_v60 }
 0x54e   : > { %3135 = vmatprep.subr.mxu0 %v3580_v62 }
 0x54f   : > { %3136 = vmatpush3.msra.mxu0 %v3580_v62 }
 0x608   : > { %v3111_v37 = vpop.f32.mrf.mxu0 }
 0x60a   : > { %v1393_v39 = vpop.f32.mrf.mxu0 }
 0x60b   : > { %3123 = vmatprep.mubr.msk.f32.mxu1 %vm359_vm0, %v1393_v39 }
 0x60c   : > { %v3114_v42 = vpop.f32.mrf.mxu0  ;;  %3124 = vmatmul.mubr.msk.f32.vlgmr.msra.gmra.mxu1 %vm359_vm0, %v3111_v37  ;;  %v2242_v37 = vpop.permute.xlu1 %2241 }
 0x60e   : > { %v1403_v44 = vpop.f32.mrf.mxu0 }
 0x60f   : > { %3126 = vmatprep.mubr.msk.f32.mxu1 %vm359_vm0, %v1403_v44 }
 0x610   : > { %3127 = vmatmul.mubr.msk.f32.gmra.mxu1 %vm359_vm0, %v3114_v42 }
 0x6cc   : > { %v3125_v45 = vpop.f32.mrf.mxu1 }
 0x6ce   : > { %v1490_v46 = vpop.f32.mrf.mxu1 }
 0x6cf   : > { %3137 = vmatprep.mubr.msk.f32.mxu0 %vm359_vm0, %v1490_v46  ;;  %v2229_v46 = vand.u32 2147483648, %v3563_v57 }
 0x6d0   : > { %v3128_v47 = vpop.f32.mrf.mxu1  ;;  %3138 = vmatmul.mubr.msk.f32.vlgmr.msra.gmra.mxu0 %vm359_vm0, %v3125_v45  ;;  %v2227_v45 = vsel %vm2226_vm7, %v3563_v57, %v2225_v36 }
 0x6d2   : > { %v1500_v48 = vpop.f32.mrf.mxu1 }
 0x6d3   : > { %3140 = vmatprep.mubr.msk.f32.mxu0 %vm359_vm0, %v1500_v48 }
 0x6d4   : > { %3141 = vmatmul.mubr.msk.f32.gmra.mxu0 %vm359_vm0, %v3128_v47 }
 0x790   : > { %v3139_v49 = vpop.f32.mrf.mxu0 }
 0x791   : > { %v1611_v63 = vmul.f32 0.5, %v3139_v49 }
 0x792   : > { %v1591_v50 = vpop.f32.mrf.mxu0 }
 0x793   : > { %v1610_v52 = vmul.f32 0.5, %v1591_v50  ;;  %v1615_v6 = vsub.f32 %v1510_v4, %v1611_v63  ;;  %v2247_v63 = vpop.permute.xlu0 %2246 }
 0x794   : > { %v3142_v53 = vpop.f32.mrf.mxu0 }
 0x795   : > { %v1614_v54 = vsub.f32 %v1509_v51, %v1610_v52  ;;  %v1613_v56 = vmul.f32 0.5, %v3142_v53  ;;  %v1813_v24 = vmul.f32 1.5, %v1615_v6  ;;  %v2252_v51 = vpop.permute.xlu1 %2251  ;;  %v2230_v52 = vsel %vm2228_vm8, %v2229_v46, %v2227_v45 }
 0x796   : > { %v1601_v61 = vpop.f32.mrf.mxu0 }
 0x797   : > { %v1617_v0 = vsub.f32 %v1512_v55, %v1613_v56  ;;  %v1612_v2 = vmul.f32 0.5, %v1601_v61  ;;  %3151 = vmatprep.mubr.msk.f32.mxu1 %vm359_vm0, %v1614_v54  ;;  %v1812_v40 = vmul.f32 1.5, %v1614_v54 }
 0x799   : > { %v1616_v5 = vsub.f32 %v1511_v1, %v1612_v2  ;;  %3143 = vmatprep.subr.mxu1 %v1617_v0  ;;  %3157 = vmatprep.subr.mxu0 %v1617_v0  ;;  %v1815_v17 = vmul.f32 1.5, %v1617_v0 }
 0x79a   : > { %3144 = vmatpush3.msra.mxu1 %v1617_v0  ;;  %3158 = vmatpush3.msra.mxu0 %v1617_v0 }
 0x79b   : > { %3145 = vmatprep.subr.mxu1 %v1616_v5  ;;  %3159 = vmatprep.subr.mxu0 %v1616_v5  ;;  %v1814_v22 = vmul.f32 1.5, %v1616_v5 }
 0x79c   : > { %3146 = vmatpush3.msra.mxu1 %v1616_v5  ;;  %3160 = vmatpush3.msra.mxu0 %v1616_v5 }
 0x79d   : > { %3147 = vmatprep.subr.mxu1 %v1615_v6  ;;  %3161 = vmatprep.subr.mxu0 %v1615_v6 }
 0x79e   : > { %3148 = vmatpush3.msra.mxu1 %v1615_v6  ;;  %3162 = vmatpush3.msra.mxu0 %v1615_v6 }
 0x79f   : > { %3149 = vmatprep.subr.mxu1 %v1614_v54  ;;  %3163 = vmatprep.subr.mxu0 %v1614_v54 }
 0x7a0   : > { %3150 = vmatpush3.msra.mxu1 %v1614_v54  ;;  %3164 = vmatpush3.msra.mxu0 %v1614_v54 }
 0x7a1   : > { %3152 = vmatmul.mubr.msk.f32.vlgmr.msra.gmra.mxu1 %vm359_vm0, %v1615_v6  ;;  %3171 = vmatprep.subr.mxu1 %v3566_v58 }
 0x7a2   : > { %3154 = vmatprep.mubr.msk.f32.mxu1 %vm359_vm0, %v1616_v5  ;;  %3172 = vmatpush3.msra.mxu1 %v3566_v58 }
 0x7a3   : > { %3173 = vmatprep.subr.mxu1 %v3570_v59 }
 0x7a4   : > { %3174 = vmatpush3.msra.mxu1 %v3570_v59 }
 0x7a5   : > { %3155 = vmatmul.mubr.msk.f32.gmra.mxu1 %vm359_vm0, %v1617_v0  ;;  %3175 = vmatprep.subr.mxu1 %v3575_v60 }
 0x7a6   : > { %3176 = vmatpush3.msra.mxu1 %v3575_v60 }
 0x7a7   : > { %3177 = vmatprep.subr.mxu1 %v3580_v62 }
 0x7a8   : > { %3178 = vmatpush3.msra.mxu1 %v3580_v62 }
 0x861   : > { %v3153_v7 = vpop.f32.mrf.mxu1 }
 0x863   : > { %v1696_v8 = vpop.f32.mrf.mxu1 }
 0x864   : > { %3165 = vmatprep.mubr.msk.f32.mxu0 %vm359_vm0, %v1696_v8 }
 0x865   : > { %v3156_v9 = vpop.f32.mrf.mxu1  ;;  %3166 = vmatmul.mubr.msk.f32.vlgmr.msra.gmra.mxu0 %vm359_vm0, %v3153_v7 }
 0x867   : > { %v1706_v10 = vpop.f32.mrf.mxu1 }
 0x868   : > { %3168 = vmatprep.mubr.msk.f32.mxu0 %vm359_vm0, %v1706_v10  ;;  %v2257_v10 = vpop.permute.xlu1 %2256 }
 0x869   : > { %3169 = vmatmul.mubr.msk.f32.gmra.mxu0 %vm359_vm0, %v3156_v9 }
 0x925   : > { %v3167_v11 = vpop.f32.mrf.mxu0 }
 0x927   : > { %v1793_v12 = vpop.f32.mrf.mxu0 }
 0x928   : > { %3179 = vmatprep.mubr.msk.f32.mxu1 %vm359_vm0, %v1793_v12 }
 0x929   : > { %v3170_v13 = vpop.f32.mrf.mxu0  ;;  %3180 = vmatmul.mubr.msk.f32.vlgmr.msra.gmra.mxu1 %vm359_vm0, %v3167_v11 }
 0x92b   : > { %v1803_v14 = vpop.f32.mrf.mxu0 }
 0x92c   : > { %3182 = vmatprep.mubr.msk.f32.mxu1 %vm359_vm0, %v1803_v14 }
 0x92d   : > { %3183 = vmatmul.mubr.msk.f32.gmra.mxu1 %vm359_vm0, %v3170_v13 }
 0x9e9   : > { %v3181_v15 = vpop.f32.mrf.mxu1 }
 0x9ea   : > { %v1914_v20 = vmul.f32 0.5, %v3181_v15 }
 0x9eb   : > { %v1894_v38 = vpop.f32.mrf.mxu1 }
 0x9ec   : > { %v1913_v41 = vmul.f32 0.5, %v1894_v38  ;;  %v1918_v26 = vsub.f32 %v1813_v24, %v1914_v20  ;;  %v2265_v24 = vld [vmem:[%s346_s30 + $0x10] sm:$0xff] }
 0x9ed   : > { %v3184_v43 = vpop.f32.mrf.mxu1 }
 0x9ee   : > { %v3652_v16 = vsub.f32 %v1812_v40, %v1913_v41  ;;  %v1916_v18 = vmul.f32 0.5, %v3184_v43  ;;  %v2116_v42 = vmul.f32 1.5, %v1918_v26 }
 0x9ef   : > { %v1904_v19 = vpop.f32.mrf.mxu1 }
 0x9f0   : > { %v3654_v21 = vsub.f32 %v1815_v17, %v1916_v18  ;;  %v1915_v23 = vmul.f32 0.5, %v1904_v19  ;;  %3193 = vmatprep.mubr.msk.f32.mxu0 %vm359_vm0, %v3652_v16  ;;  %v2115_v49 = vmul.f32 1.5, %v3652_v16  ;;  %v2264_v19 = vld [vmem:[%s346_s30 + $0x8] sm:$0xff] }
 0x9f2   : > { %v3658_v25 = vsub.f32 %v1814_v22, %v1915_v23  ;;  %3185 = vmatprep.subr.mxu0 %v3654_v21  ;;  %3199 = vmatprep.subr.mxu1 %v3654_v21  ;;  %v2118_v56 = vmul.f32 1.5, %v3654_v21  ;;  %v2263_v22 = vld [vmem:[%s346_s30] sm:$0xff] }
 0x9f3   : > { %3186 = vmatpush3.msra.mxu0 %v3654_v21  ;;  %3200 = vmatpush3.msra.mxu1 %v3654_v21 }
 0x9f4   : > { %3187 = vmatprep.subr.mxu0 %v3658_v25  ;;  %3201 = vmatprep.subr.mxu1 %v3658_v25  ;;  %v2117_v0 = vmul.f32 1.5, %v3658_v25 }
 0x9f5   : > { %3188 = vmatpush3.msra.mxu0 %v3658_v25  ;;  %3202 = vmatpush3.msra.mxu1 %v3658_v25 }
 0x9f6   : > { %3189 = vmatprep.subr.mxu0 %v1918_v26  ;;  %3203 = vmatprep.subr.mxu1 %v1918_v26 }
 0x9f7   : > { %3190 = vmatpush3.msra.mxu0 %v1918_v26  ;;  %3204 = vmatpush3.msra.mxu1 %v1918_v26 }
 0x9f8   : > { %3191 = vmatprep.subr.mxu0 %v3652_v16  ;;  %3205 = vmatprep.subr.mxu1 %v3652_v16 }
 0x9f9   : > { %3192 = vmatpush3.msra.mxu0 %v3652_v16  ;;  %3206 = vmatpush3.msra.mxu1 %v3652_v16 }
 0x9fa   : > { %3194 = vmatmul.mubr.msk.f32.vlgmr.msra.gmra.mxu0 %vm359_vm0, %v1918_v26  ;;  %3213 = vmatprep.subr.mxu0 %v3566_v58 }
 0x9fb   : > { %3196 = vmatprep.mubr.msk.f32.mxu0 %vm359_vm0, %v3658_v25  ;;  %3214 = vmatpush3.msra.mxu0 %v3566_v58  ;;  %v2266_v25 = vld [vmem:[%s346_s30 + $0x18] sm:$0xff] }
 0x9fc   : > { %3215 = vmatprep.subr.mxu0 %v3570_v59  ;;  %3227 = vmatprep.subr.bf16.mxu1 %v3280_v31 }
 0x9fd   : > { %3216 = vmatpush3.msra.mxu0 %v3570_v59 }
 0x9fe   : > { %3197 = vmatmul.mubr.msk.f32.gmra.mxu0 %vm359_vm0, %v3654_v21  ;;  %3217 = vmatprep.subr.mxu0 %v3575_v60 }
 0x9ff   : > { %3218 = vmatpush3.msra.mxu0 %v3575_v60 }
 0xa00   : > { %3219 = vmatprep.subr.mxu0 %v3580_v62 }
 0xa01   : > { %3220 = vmatpush3.msra.mxu0 %v3580_v62 }
 0xa02   : > { %3235 = vmatprep.subr.bf16.mxu0 %v3281_v32 }
 0xaba   : > { %v3195_v27 = vpop.f32.mrf.mxu0 }
 0xabc   : > { %v1999_v28 = vpop.f32.mrf.mxu0 }
 0xabd   : > { %3207 = vmatprep.mubr.msk.f32.mxu1 %vm359_vm0, %v1999_v28 }
 0xabe   : > { %v3198_v58 = vpop.f32.mrf.mxu0  ;;  %3208 = vmatmul.mubr.msk.f32.vlgmr.msra.gmra.mxu1 %vm359_vm0, %v3195_v27 }
 0xabf   : > { %3228 = vmatpush3.bf16.msra.mxu1 %v3280_v31 }
 0xac0   : > { %v2009_v59 = vpop.f32.mrf.mxu0  ;;  %3229 = vmatprep.subr.bf16.mxu1 %v3282_v33 }
 0xac1   : > { %3210 = vmatprep.mubr.msk.f32.mxu1 %vm359_vm0, %v2009_v59 }
 0xac2   : > { %3211 = vmatmul.mubr.msk.f32.gmra.mxu1 %vm359_vm0, %v3198_v58 }
 0xac3   : > { %3230 = vmatpush3.bf16.msra.mxu1 %v3282_v33 }
 0xb7e   : > { %v3209_v60 = vpop.f32.mrf.mxu1 }
 0xb80   : > { %v2096_v29 = vpop.f32.mrf.mxu1 }
 0xb81   : > { %3221 = vmatprep.mubr.msk.f32.mxu0 %vm359_vm0, %v2096_v29 }
 0xb82   : > { %v3212_v62 = vpop.f32.mrf.mxu1  ;;  %3222 = vmatmul.mubr.msk.f32.vlgmr.msra.gmra.mxu0 %vm359_vm0, %v3209_v60 }
 0xb83   : > { %3236 = vmatpush3.bf16.msra.mxu0 %v3281_v32 }
 0xb84   : > { %v2106_v30 = vpop.f32.mrf.mxu1  ;;  %3237 = vmatprep.subr.bf16.mxu0 %v3283_v34 }
 0xb85   : > { %3224 = vmatprep.mubr.msk.f32.mxu0 %vm359_vm0, %v2106_v30 }
 0xb86   : > { %3225 = vmatmul.mubr.msk.f32.gmra.mxu0 %vm359_vm0, %v3212_v62 }
 0xb87   : > { %3238 = vmatpush3.bf16.msra.mxu0 %v3283_v34 }
 0xc42   : > { %v3223_v39 = vpop.f32.mrf.mxu0 }
 0xc43   : > { %v2217_v44 = vmul.f32 0.5, %v3223_v39 }
 0xc44   : > { %v2197_v47 = vpop.f32.mrf.mxu0 }
 0xc45   : > { %v2221_v48 = vsub.f32 %v2116_v42, %v2217_v44  ;;  %v2216_v50 = vmul.f32 0.5, %v2197_v47 }
 0xc46   : > { %v3226_v53 = vpop.f32.mrf.mxu0 }
 0xc47   : > { %v2232_v54 = vmul.f32 %v2230_v52, %v2221_v48  ;;  %v2220_v55 = vsub.f32 %v2115_v49, %v2216_v50  ;;  %v2219_v61 = vmul.f32 0.5, %v3226_v53 }
 0xc48   : > { %v2207_v1 = vpop.f32.mrf.mxu0 }
 0xc49   : > { %2492 = vst.msk [vmem:[%s357_s27 + $0x8] sm:$0xff] %vm359_vm0, %v2232_v54  ;;  %v2231_v57 = vmul.f32 %v2230_v52, %v2220_v55  ;;  %v2223_v2 = vsub.f32 %v2118_v56, %v2219_v61  ;;  %v2218_v4 = vmul.f32 0.5, %v2207_v1  ;;  %v2260_v5 = vmul.f32 %v2247_v63, %v2232_v54 }
 0xc4b   : > { %v2259_v6 = vmul.f32 %v2242_v37, %v2231_v57  ;;  %2491 = vst.msk [vmem:[%s357_s27] sm:$0xff] %vm359_vm0, %v2231_v57  ;;  %v2234_v7 = vmul.f32 %v2230_v52, %v2223_v2  ;;  %v2222_v8 = vsub.f32 %v2117_v0, %v2218_v4  ;;  %v2268_v9 = vmul.f32 %v2260_v5, %v3540_v3 }
 0xc4d   : > { %v2262_v11 = vmul.f32 %v2257_v10, %v2234_v7  ;;  %2494 = vst.msk [vmem:[%s357_s27 + $0x18] sm:$0xff] %vm359_vm0, %v2234_v7  ;;  %v2233_v12 = vmul.f32 %v2230_v52, %v2222_v8  ;;  %v2274_v13 = vsel %vm359_vm0, %v2268_v9, 0.0  ;;  %v2287_v14 = vpack.c.bf16 %v2260_v5, %v2259_v6 }
 0xc4e   : > { %2275 = vadd.xlane.f32.xlu0 %v2274_v13  ;;  %v2267_v15 = vmul.f32 %v2259_v6, %v3540_v3 }
 0xc4f   : > { %v2261_v38 = vmul.f32 %v2252_v51, %v2233_v12  ;;  %2493 = vst.msk [vmem:[%s357_s27 + $0x10] sm:$0xff] %vm359_vm0, %v2233_v12  ;;  %3231 = vmatprep.mubr.msk.bf16.mxu1 %vm359_vm0, %v2287_v14  ;;  %3239 = vmatprep.mubr.msk.bf16.mxu0 %vm359_vm0, %v2287_v14  ;;  %v2270_v41 = vmul.f32 %v2262_v11, %v3540_v3 }
 0xc50   : > { %v2271_v40 = vsel %vm359_vm0, %v2267_v15, 0.0 }
 0xc51   : > { %v2288_v43 = vpack.c.bf16 %v2262_v11, %v2261_v38  ;;  %2272 = vadd.xlane.f32.xlu1 %v2271_v40  ;;  %v2269_v16 = vmul.f32 %v2261_v38, %v3540_v3  ;;  %v2280_v18 = vsel %vm359_vm0, %v2270_v41, 0.0 }
 0xc53   : > { %3232 = vmatmul.mubr.msk.bf16.vlgmr.msra.gmra.mxu1 %vm359_vm0, %v2288_v43  ;;  %3240 = vmatmul.mubr.msk.bf16.vlgmr.msra.gmra.mxu0 %vm359_vm0, %v2288_v43  ;;  %v2277_v17 = vsel %vm359_vm0, %v2269_v16, 0.0 }
 0xc54   : > { %2278 = vadd.xlane.f32.xlu0 %v2277_v17 }
 0xc55   : > { %2281 = vadd.xlane.f32.xlu1 %v2280_v18 }
 0xcd7   : > { %v2276_v20 = vpop.xlane.xlu0 %2275 }
 0xcd8   : > { %v2284_v21 = vsub.f32 %v2264_v19, %v2276_v20 }
 0xcda   : > { %v2273_v23 = vpop.xlane.xlu1 %2272  ;;  %2300 = vperm.xlu1 %3275, %v2284_v21  }
 0xcdb   : > { %v2283_v3 = vsub.f32 %v2263_v22, %v2273_v23 }
 0xcdd   : > { %2295 = vperm.xlu0 %3274, %v2283_v3   ;;  %v2279_v26 = vpop.xlane.xlu0 %2278 }
 0xcde   : > { %v2282_v27 = vpop.xlane.xlu1 %2281  ;;  %v2285_v28 = vsub.f32 %v2265_v24, %v2279_v26 }
 0xcdf   : > { %v2286_v58 = vsub.f32 %v2266_v25, %v2282_v27 }
 0xce0   : > { %2305 = vperm.xlu1 %3275, %v2285_v28  }
 0xce1   : > { %2310 = vperm.xlu0 %3274, %v2286_v58  }
 0xd13   : > { %v3233_v59 = vpop.f32.mrf.mxu1  ;;  %v3241_v60 = vpop.f32.mrf.mxu0 }
 0xd15   : > { %v2365_v29 = vpop.f32.mrf.mxu1  ;;  %v2451_v62 = vpop.f32.mrf.mxu0 }
 0xd17   : > { %v3234_v30 = vpop.f32.mrf.mxu1  ;;  %v3242_v31 = vpop.f32.mrf.mxu0 }
 0xd19   : > { %v2368_v32 = vpop.f32.mrf.mxu1  ;;  %v2454_v33 = vpop.f32.mrf.mxu0 }
 0xd55   : > { %v2301_v34 = vpop.permute.xlu1 %2300 }
 0xd56   : > { %v2369_v35 = vadd.f32 %v2368_v32, %v2301_v34  ;;  %v2455_v36 = vadd.f32 %v2454_v33, %v2301_v34 }
 0xd58   : > { %v2857_v37 = vpack.c.bf16 %v2369_v35, %v2369_v35  ;;  %v2861_v39 = vpack.c.bf16 %v2455_v36, %v2455_v36  ;;  %v2296_v42 = vpop.permute.xlu0 %2295 }
 0xd59   : > { %v2366_v44 = vadd.f32 %v2365_v29, %v2296_v42  ;;  %v2452_v45 = vadd.f32 %v2451_v62, %v2296_v42 }
 0xd5a   : > { %2398 = vst.msk [vmem:[%s321_s6 + $0x4] sm:$0xf] %vm2396_vm9, %v2857_v37  ;;  %2843 = vst.msk [vmem:[%s321_s6 + $0x14] sm:$0xf] %vm2396_vm9, %v2861_v39 }
 0xd5b   : > { %v2856_v46 = vpack.c.bf16 %v2366_v44, %v2366_v44  ;;  %v2860_v47 = vpack.c.bf16 %v2452_v45, %v2452_v45  ;;  %v2306_v48 = vpop.permute.xlu1 %2305 }
 0xd5c   : > { %v2374_v49 = vadd.f32 %v3233_v59, %v2306_v48  ;;  %v2460_v50 = vadd.f32 %v3241_v60, %v2306_v48  ;;  %v2311_v51 = vpop.permute.xlu0 %2310 }
 0xd5d   : > { %2397 = vst.msk [vmem:[%s321_s6] sm:$0xf] %vm2396_vm9, %v2856_v46  ;;  %2842 = vst.msk [vmem:[%s321_s6 + $0x10] sm:$0xf] %vm2396_vm9, %v2860_v47  ;;  %v2377_v52 = vadd.f32 %v3234_v30, %v2311_v51  ;;  %v2463_v53 = vadd.f32 %v3242_v31, %v2311_v51  ;;  %2511 = sbr.rel (!%p3380_p5) target bundleno = 3434 (0xd6a), region = 77 }
 0xd5e   : > { %v2858_v54 = vpack.c.bf16 %v2374_v49, %v2374_v49  ;;  %v2862_v55 = vpack.c.bf16 %v2460_v50, %v2460_v50 }
 0xd5f   : > { %v2859_v56 = vpack.c.bf16 %v2377_v52, %v2377_v52  ;;  %v2863_v61 = vpack.c.bf16 %v2463_v53, %v2463_v53 }
 0xd60   : > { %2399 = vst.msk [vmem:[%s321_s6 + $0x8] sm:$0xf] %vm2396_vm9, %v2858_v54  ;;  %2844 = vst.msk [vmem:[%s321_s6 + $0x18] sm:$0xf] %vm2396_vm9, %v2862_v55 }
 0xd61   : > { %2400 = vst.msk [vmem:[%s321_s6 + $0xc] sm:$0xf] %vm2396_vm9, %v2859_v56  ;;  %2845 = vst.msk [vmem:[%s321_s6 + $0x1c] sm:$0xf] %vm2396_vm9, %v2863_v61 }
 0xd64   : > { %v2531_v63 = vld [vmem:[%s321_s6] sm:$0xff]   ;;  %v2539_v1 = vld [vmem:[%s321_s6 + $0x10] sm:$0xff]  }
 0xd65   : > { %2532 = vst [vmem:[%s2514_s10] sm:$0xff] %v2531_v63   ;;  %2540 = vst [vmem:[%s2514_s10 + $0x20] sm:$0xff] %v2539_v1  }
 0xd68   : > { %v2535_v0 = vld [vmem:[%s321_s6 + $0x8] sm:$0xff]   ;;  %v2543_v57 = vld [vmem:[%s321_s6 + $0x18] sm:$0xff]  }
 0xd69   : > { %2536 = vst [vmem:[%s2514_s10 + $0x8] sm:$0xff] %v2535_v0   ;;  %2544 = vst [vmem:[%s2514_s10 + $0x28] sm:$0xff] %v2543_v57  }
 0xd6a PF: > { %p13_p11 = scmp.ge.s32.totalorder %s3368_s22, 4   ;;  %s3768_s18 = smov %s3310_s19 }
 0xd6b   : > { %s3769_s19 = smov %s3378_s25  ;;  %s3770_s20 = smov %s3368_s22 }
 0xd6c   :  { %15 = sbr.rel (!%p13_p11) target bundleno = 2 (0x2), region = 181 }

</bundles_post_ra>
